<compile_context>
chip_gen: v6e
topology: v6e:2x2x1
jax: 0.10.0
libtpu: 0.0.40
codegen_flags: <defaults>
</compile_context>

<pallas_src>
import functools

import jax
import jax.numpy as jnp
from jax.experimental import pallas as pl
from jax.experimental.pallas import tpu as pltpu

EPS = 1e-6
LANE = 128
VMEM_BUDGET = 48 * 1024 * 1024          # conservative fused-path budget


def _round_up(n, m):
    return ((n + m - 1) // m) * m


def _pad_to(a, shape):
    pads = [(0, t - s) for s, t in zip(a.shape, shape)]
    if all(p == (0, 0) for p in pads):
        return a
    return jnp.pad(a, pads)


def _full_spec(a):
    nd = a.ndim
    return pl.BlockSpec(a.shape, lambda *_, _nd=nd: (0,) * _nd)


# --------------------------------------------------------------------------
# shared in-kernel encoder-block body
# --------------------------------------------------------------------------
def _block_body(d_model, cdt, fmask, xq2, xkv2, Bb, Tq, S,
                wq_ref, bq_ref, wk_ref, bk_ref, wv_ref, bv_ref,
                wo_ref, bo_ref, w1_ref, bf1_ref, w2_ref, bf2_ref,
                g1, b1, g2, b2):
    """One EncoderBlock on flattened (rows, Dp) activations; returns f32."""
    f32 = jnp.float32

    def linear(h, w_ref, b_ref):
        # operands stay in the input dtype; MXU accumulates in f32.
        return (jnp.dot(h, w_ref[...], preferred_element_type=f32)
                + b_ref[...].astype(f32))

    def layer_norm(h, g, b):
        # torch-style: gamma * (x - mean) / (std + eps) + beta,
        # unbiased std (divide by n-1), eps added to std.
        mean = jnp.sum(h, axis=-1, keepdims=True) * (1.0 / d_model)
        c = h - mean
        cm = c * fmask                     # padded lanes do not pollute stats
        var = jnp.sum(cm * cm, axis=-1, keepdims=True) * (1.0 / (d_model - 1))
        inv = pl.reciprocal(jnp.sqrt(var) + EPS, approx=True)
        return g * c * inv + b

    # ---- self attention (q = k = v = x) ----
    q = linear(xq2.astype(cdt), wq_ref, bq_ref).astype(cdt).reshape(Bb, Tq, -1)
    k = linear(xkv2.astype(cdt), wk_ref, bk_ref).astype(cdt).reshape(Bb, S, -1)
    v = linear(xkv2.astype(cdt), wv_ref, bv_ref).astype(cdt).reshape(Bb, S, -1)

    # scores = q @ k^T, contracting d_k directly (no XLU transpose).
    # NOTE: reference does NOT scale by 1/sqrt(d_k) - kept intentionally.
    scores = jnp.einsum('bqd,bkd->bqk', q, k, preferred_element_type=jnp.float32)
    scores = scores - jnp.max(scores, axis=-1, keepdims=True)
    p = jnp.exp(scores)
    p = p * pl.reciprocal(jnp.sum(p, axis=-1, keepdims=True), approx=True)
    # attention-prob dropout is identity in eval mode

    attn = jnp.einsum('bqk,bkd->bqd', p.astype(cdt), v,
                      preferred_element_type=jnp.float32)
    attn = linear(attn.astype(cdt).reshape(Bb * Tq, -1), wo_ref, bo_ref)

    # ---- residual 0 + layernorm ----
    h = layer_norm(xq2.astype(f32) + attn, g1, b1)

    # ---- feed forward (dropout = identity) ----
    f = jnp.maximum(linear(h.astype(cdt), w1_ref, bf1_ref), 0.0)
    f = linear(f.astype(cdt), w2_ref, bf2_ref)

    # ---- residual 1 + layernorm ----
    return layer_norm(h + f, g2, b2)


# --------------------------------------------------------------------------
# kernels
# --------------------------------------------------------------------------
def _encoder_fused_kernel(d_model, num_layers, x_ref, *refs):
    """All encoder layers in one kernel (whole sequence resident in VMEM)."""
    (wq_ref, bq_ref, wk_ref, bk_ref, wv_ref, bv_ref, wo_ref, bo_ref,
     w1_ref, bf1_ref, w2_ref, bf2_ref,
     g1s_ref, b1s_ref, g2s_ref, b2s_ref, o_ref) = refs

    f32 = jnp.float32
    Bb, S, Dp = x_ref.shape
    cdt = x_ref.dtype
    lane = jax.lax.broadcasted_iota(jnp.int32, (1, Dp), 1)
    fmask = (lane < d_model).astype(f32)

    x2 = x_ref[...].reshape(Bb * S, Dp)
    for l in range(num_layers):           # unrolled; L is small and static
        x2 = _block_body(
            d_model, cdt, fmask, x2, x2, Bb, S, S,
            wq_ref, bq_ref, wk_ref, bk_ref, wv_ref, bv_ref, wo_ref, bo_ref,
            w1_ref, bf1_ref, w2_ref, bf2_ref,
            g1s_ref[l].astype(f32), b1s_ref[l].astype(f32),
            g2s_ref[l].astype(f32), b2s_ref[l].astype(f32))
    o_ref[...] = x2.reshape(Bb, S, Dp).astype(o_ref.dtype)


def _encoder_block_kernel(d_model, xq_ref, xkv_ref, *refs):
    """One EncoderBlock; query-tiled fallback for long sequences."""
    (wq_ref, bq_ref, wk_ref, bk_ref, wv_ref, bv_ref, wo_ref, bo_ref,
     w1_ref, bf1_ref, w2_ref, bf2_ref,
     g1_ref, b1_ref, g2_ref, b2_ref, o_ref) = refs

    f32 = jnp.float32
    Bb, Tq, Dp = xq_ref.shape
    S = xkv_ref.shape[1]
    cdt = xq_ref.dtype
    lane = jax.lax.broadcasted_iota(jnp.int32, (1, Dp), 1)
    fmask = (lane < d_model).astype(f32)

    # TODO(synk): k/v projections are recomputed per query tile; hoist into a
    # separate projection kernel (or flash loop) if nq becomes large.
    y = _block_body(
        d_model, cdt, fmask,
        xq_ref[...].reshape(Bb * Tq, Dp), xkv_ref[...].reshape(Bb * S, Dp),
        Bb, Tq, S,
        wq_ref, bq_ref, wk_ref, bk_ref, wv_ref, bv_ref, wo_ref, bo_ref,
        w1_ref, bf1_ref, w2_ref, bf2_ref,
        g1_ref[...].astype(f32), b1_ref[...].astype(f32),
        g2_ref[...].astype(f32), b2_ref[...].astype(f32))
    o_ref[...] = y.reshape(Bb, Tq, Dp).astype(o_ref.dtype)


# --------------------------------------------------------------------------
# wrapper
# --------------------------------------------------------------------------
def encoder_forward(x, params):
    """Encoder.forward: num_layers EncoderBlocks (shared attn/FF weights)."""
    B, S, D = x.shape
    attn, ff, lns = params["attn"], params["ff"], params["ln"]
    num_layers = len(lns)
    d_k = attn["wq"].shape[1]
    d_v = attn["wv"].shape[1]
    d_ff = ff["w1"].shape[1]

    # lane-dense padding of every feature axis (zeros keep the math unchanged;
    # LayerNorm stats use the real d_model via the in-kernel lane mask).
    Dp, dkp, dvp, dfp = (_round_up(n, LANE) for n in (D, d_k, d_v, d_ff))

    shared = (
        _pad_to(attn["wq"], (Dp, dkp)), _pad_to(attn["bq"], (1, dkp)),
        _pad_to(attn["wk"], (Dp, dkp)), _pad_to(attn["bk"], (1, dkp)),
        _pad_to(attn["wv"], (Dp, dvp)), _pad_to(attn["bv"], (1, dvp)),
        _pad_to(attn["wo"], (dvp, Dp)), _pad_to(attn["bo"], (1, Dp)),
        _pad_to(ff["w1"], (Dp, dfp)), _pad_to(ff["bf1"], (1, dfp)),
        _pad_to(ff["w2"], (dfp, Dp)), _pad_to(ff["bf2"], (1, Dp)),
    )

    # --- tiling ---
    tq = 128 if (S > 128 and S % 128 == 0) else S       # query tile
    nq = S // tq
    # fold batch rows so the MXU M dim isn't tiny, but keep >= 2 grid steps
    # where possible (v7x has 2 TensorCores).
    Bb = max(1, min(B, 256 // max(S, 1)))
    while B % Bb:
        Bb -= 1
    while Bb > 1 and (B // Bb) * nq < 2:
        Bb -= 1
        while B % Bb:
            Bb -= 1
    nb = B // Bb

    itemsize = jnp.dtype(x.dtype).itemsize
    weight_bytes = sum(int(w.size) * jnp.dtype(w.dtype).itemsize for w in shared)
    ln_bytes = 4 * num_layers * Dp * jnp.dtype(lns[0]["g1"].dtype).itemsize
    flops_layer = 2 * B * S * (2 * D * d_k + D * d_v + S * d_k + S * d_v
                               + d_v * D + 2 * D * d_ff)

    xp = _pad_to(x, (B, S, Dp))

    # rough per-grid-step VMEM need for the fused path
    fused_est = (
        4 * Bb * S * Dp * itemsize                        # in + out (dbl-buf)
        + 2 * weight_bytes + 2 * ln_bytes
        + 2 * Bb * S * S * 4                              # scores / probs f32
        + 6 * Bb * S * max(dkp, dvp, dfp, Dp) * 4)        # live intermediates

    if nq == 1 and fused_est < VMEM_BUDGET:
        # ---- fused path: all layers in one kernel ----
        ln_stacks = tuple(
            _pad_to(jnp.stack([ln[k] for ln in lns]), (num_layers, 1, Dp))
            for k in ("g1", "be1", "g2", "be2"))
        in_specs = (
            [pl.BlockSpec((Bb, S, Dp), lambda bi: (bi, 0, 0))]
            + [_full_spec(w) for w in shared]
            + [_full_spec(w) for w in ln_stacks])
        out_spec = pl.BlockSpec((Bb, S, Dp), lambda bi: (bi, 0, 0))
        cost = pl.CostEstimate(
            flops=num_layers * flops_layer,
            transcendentals=num_layers * B * S * S,
            bytes_accessed=2 * B * S * Dp * itemsize + weight_bytes + ln_bytes)
        fused_fn = pl.pallas_call(
            functools.partial(_encoder_fused_kernel, D, num_layers),
            out_shape=jax.ShapeDtypeStruct((B, S, Dp), x.dtype),
            grid=(nb,),
            in_specs=in_specs,
            out_specs=out_spec,
            compiler_params=pltpu.CompilerParams(
                dimension_semantics=("parallel",),
                vmem_limit_bytes=64 * 1024 * 1024),
            cost_estimate=cost,
        )
        yp = fused_fn(xp, *shared, *ln_stacks)
        return yp[:, :, :D]

    # ---- fallback: one pallas_call per layer, query-tiled ----
    per_layer = [
        tuple(_pad_to(ln[k], (1, Dp)) for k in ("g1", "be1", "g2", "be2"))
        for ln in lns]
    in_specs = (
        [pl.BlockSpec((Bb, tq, Dp), lambda bi, qi: (bi, qi, 0)),   # query rows
         pl.BlockSpec((Bb, S, Dp), lambda bi, qi: (bi, 0, 0))]     # key/value
        + [_full_spec(w) for w in shared]
        + [_full_spec(w) for w in per_layer[0]])
    out_spec = pl.BlockSpec((Bb, tq, Dp), lambda bi, qi: (bi, qi, 0))
    cost = pl.CostEstimate(
        flops=flops_layer,
        transcendentals=B * S * S,
        bytes_accessed=3 * B * S * Dp * itemsize + weight_bytes
                       + 4 * Dp * itemsize)
    block_fn = pl.pallas_call(
        functools.partial(_encoder_block_kernel, D),
        out_shape=jax.ShapeDtypeStruct((B, S, Dp), x.dtype),
        grid=(nb, nq),
        in_specs=in_specs,
        out_specs=out_spec,
        compiler_params=pltpu.CompilerParams(
            dimension_semantics=("parallel", "parallel"),
            vmem_limit_bytes=64 * 1024 * 1024),
        cost_estimate=cost,
    )
    for ln in per_layer:        # attn/FF weights shared, LN params per layer
        xp = block_fn(xp, xp, *shared, *ln)
    return xp[:, :, :D]


# --------------------------------------------------------------------------
# parameters + pure-JAX reference
# --------------------------------------------------------------------------
def init_params(key, num_layers, d_model, d_ff, d_k=64, d_v=64,
                dtype=jnp.float32):
    """Deterministic synthetic parameters (shapes match the nn.Module;
    weights stored as (in, out) so the kernel computes x @ W + b)."""
    keys = jax.random.split(key, 12)
    s = 0.1

    def rnd(k, shape):
        return (s * jax.random.normal(k, shape)).astype(dtype)

    attn = {
        "wq": rnd(keys[0], (d_model, d_k)), "bq": rnd(keys[1], (1, d_k)),
        "wk": rnd(keys[2], (d_model, d_k)), "bk": rnd(keys[3], (1, d_k)),
        "wv": rnd(keys[4], (d_model, d_v)), "bv": rnd(keys[5], (1, d_v)),
        "wo": rnd(keys[6], (d_v, d_model)), "bo": rnd(keys[7], (1, d_model)),
    }
    ff = {
        "w1": rnd(keys[8], (d_model, d_ff)), "bf1": rnd(keys[9], (1, d_ff)),
        "w2": rnd(keys[10], (d_ff, d_model)), "bf2": rnd(keys[11], (1, d_model)),
    }
    ln = [
        {"g1": jnp.ones((1, d_model), dtype),
         "be1": jnp.zeros((1, d_model), dtype),
         "g2": jnp.ones((1, d_model), dtype),
         "be2": jnp.zeros((1, d_model), dtype)}
        for _ in range(num_layers)
    ]
    return {"attn": attn, "ff": ff, "ln": ln}


def _encoder_reference(x, params):
    """Pure-JAX reference mirroring the torch module (eval mode)."""
    attn, ff, lns = params["attn"], params["ff"], params["ln"]

    def ln_fn(h, g, b):
        mean = jnp.mean(h, axis=-1, keepdims=True)
        std = jnp.sqrt(jnp.var(h, axis=-1, keepdims=True, ddof=1))
        return g * (h - mean) / (std + EPS) + b

    for lp in lns:
        q = x @ attn["wq"] + attn["bq"]
        k = x @ attn["wk"] + attn["bk"]
        v = x @ attn["wv"] + attn["bv"]
        s = jnp.einsum('bqd,bkd->bqk', q, k)
        p = jax.nn.softmax(s, axis=-1)
        a = jnp.einsum('bqk,bkd->bqd', p, v) @ attn["wo"] + attn["bo"]
        x = ln_fn(x + a, lp["g1"], lp["be1"])
        f = jax.nn.relu(x @ ff["w1"] + ff["bf1"]) @ ff["w2"] + ff["bf2"]
        x = ln_fn(x + f, lp["g2"], lp["be2"])
    return x


if __name__ == "__main__":
    B, S, d_model, d_ff = 2, 8, 32, 64
    num_layers = 2
    key = jax.random.PRNGKey(0)
    kx, kp = jax.random.split(key)

    x = jax.random.normal(kx, (B, S, d_model), dtype=jnp.float32)
    params = init_params(kp, num_layers, d_model, d_ff)

    out = jax.jit(encoder_forward)(x, params)
    out = jax.block_until_ready(out)

    ref = _encoder_reference(x, params)
    assert out.shape == (B, S, d_model)
    assert bool(jnp.all(jnp.isfinite(out)))
    assert bool(jnp.allclose(out, ref, rtol=2e-2, atol=2e-2))
    print("KERNEL_OK")
</pallas_src>

<mosaic_0001>
module attributes {stable_mosaic.version = 11 : i64} {
  func.func @_encoder_fused_kernel(%arg0: i32, %arg1: memref<1x8x128xf32, #tpu.memory_space<vmem>>, %arg2: memref<128x128xf32, #tpu.memory_space<vmem>>, %arg3: memref<1x128xf32, #tpu.memory_space<vmem>>, %arg4: memref<128x128xf32, #tpu.memory_space<vmem>>, %arg5: memref<1x128xf32, #tpu.memory_space<vmem>>, %arg6: memref<128x128xf32, #tpu.memory_space<vmem>>, %arg7: memref<1x128xf32, #tpu.memory_space<vmem>>, %arg8: memref<128x128xf32, #tpu.memory_space<vmem>>, %arg9: memref<1x128xf32, #tpu.memory_space<vmem>>, %arg10: memref<128x128xf32, #tpu.memory_space<vmem>>, %arg11: memref<1x128xf32, #tpu.memory_space<vmem>>, %arg12: memref<128x128xf32, #tpu.memory_space<vmem>>, %arg13: memref<1x128xf32, #tpu.memory_space<vmem>>, %arg14: memref<2x1x128xf32, #tpu.memory_space<vmem>>, %arg15: memref<2x1x128xf32, #tpu.memory_space<vmem>>, %arg16: memref<2x1x128xf32, #tpu.memory_space<vmem>>, %arg17: memref<2x1x128xf32, #tpu.memory_space<vmem>>, %arg18: memref<1x8x128xf32, #tpu.memory_space<vmem>>) attributes {dimension_semantics = [#tpu.dimension_semantics<parallel>], iteration_bounds = array<i64: 2>, scalar_prefetch = 0 : i64, scratch_operands = 0 : i64, tpu.core_type = #tpu.core_type<tc>, window_params = [{transform_indices = @transform_0, window_bounds = array<i64: 1, 8, 128>}, {pipeline_mode = #tpu.pipeline_mode<synchronous>, transform_indices = @transform_1, window_bounds = array<i64: 128, 128>}, {pipeline_mode = #tpu.pipeline_mode<synchronous>, transform_indices = @transform_2, window_bounds = array<i64: 1, 128>}, {pipeline_mode = #tpu.pipeline_mode<synchronous>, transform_indices = @transform_3, window_bounds = array<i64: 128, 128>}, {pipeline_mode = #tpu.pipeline_mode<synchronous>, transform_indices = @transform_4, window_bounds = array<i64: 1, 128>}, {pipeline_mode = #tpu.pipeline_mode<synchronous>, transform_indices = @transform_5, window_bounds = array<i64: 128, 128>}, {pipeline_mode = #tpu.pipeline_mode<synchronous>, transform_indices = @transform_6, window_bounds = array<i64: 1, 128>}, {pipeline_mode = #tpu.pipeline_mode<synchronous>, transform_indices = @transform_7, window_bounds = array<i64: 128, 128>}, {pipeline_mode = #tpu.pipeline_mode<synchronous>, transform_indices = @transform_8, window_bounds = array<i64: 1, 128>}, {pipeline_mode = #tpu.pipeline_mode<synchronous>, transform_indices = @transform_9, window_bounds = array<i64: 128, 128>}, {pipeline_mode = #tpu.pipeline_mode<synchronous>, transform_indices = @transform_10, window_bounds = array<i64: 1, 128>}, {pipeline_mode = #tpu.pipeline_mode<synchronous>, transform_indices = @transform_11, window_bounds = array<i64: 128, 128>}, {pipeline_mode = #tpu.pipeline_mode<synchronous>, transform_indices = @transform_12, window_bounds = array<i64: 1, 128>}, {pipeline_mode = #tpu.pipeline_mode<synchronous>, transform_indices = @transform_13, window_bounds = array<i64: 2, 1, 128>}, {pipeline_mode = #tpu.pipeline_mode<synchronous>, transform_indices = @transform_14, window_bounds = array<i64: 2, 1, 128>}, {pipeline_mode = #tpu.pipeline_mode<synchronous>, transform_indices = @transform_15, window_bounds = array<i64: 2, 1, 128>}, {pipeline_mode = #tpu.pipeline_mode<synchronous>, transform_indices = @transform_16, window_bounds = array<i64: 2, 1, 128>}, {transform_indices = @transform_17, window_bounds = array<i64: 1, 8, 128>}]} {
    %0 = tpu.iota {dimensions = array<i32: 1>} : vector<1x128xi32>
    %c32_i32 = arith.constant 32 : i32
    %1 = vector.broadcast %c32_i32 : i32 to vector<1x128xi32>
    %2 = arith.cmpi slt, %0, %1 : vector<1x128xi32>
    %3 = arith.extui %2 : vector<1x128xi1> to vector<1x128xi32>
    %4 = arith.sitofp %3 : vector<1x128xi32> to vector<1x128xf32>
    %c0 = arith.constant 0 : index
    %c0_0 = arith.constant 0 : index
    %c0_1 = arith.constant 0 : index
    %5 = vector.load %arg1[%c0, %c0_0, %c0_1] : memref<1x8x128xf32, #tpu.memory_space<vmem>>, vector<1x8x128xf32>
    %6 = vector.shape_cast %5 : vector<1x8x128xf32> to vector<8x128xf32>
    %c0_2 = arith.constant 0 : index
    %c0_3 = arith.constant 0 : index
    %c0_4 = arith.constant 0 : index
    %7 = vector.load %arg14[%c0_2, %c0_3, %c0_4] : memref<2x1x128xf32, #tpu.memory_space<vmem>>, vector<1x1x128xf32>
    %8 = vector.shape_cast %7 : vector<1x1x128xf32> to vector<1x128xf32>
    %c0_5 = arith.constant 0 : index
    %c0_6 = arith.constant 0 : index
    %c0_7 = arith.constant 0 : index
    %9 = vector.load %arg15[%c0_5, %c0_6, %c0_7] : memref<2x1x128xf32, #tpu.memory_space<vmem>>, vector<1x1x128xf32>
    %10 = vector.shape_cast %9 : vector<1x1x128xf32> to vector<1x128xf32>
    %c0_8 = arith.constant 0 : index
    %c0_9 = arith.constant 0 : index
    %c0_10 = arith.constant 0 : index
    %11 = vector.load %arg16[%c0_8, %c0_9, %c0_10] : memref<2x1x128xf32, #tpu.memory_space<vmem>>, vector<1x1x128xf32>
    %12 = vector.shape_cast %11 : vector<1x1x128xf32> to vector<1x128xf32>
    %c0_11 = arith.constant 0 : index
    %c0_12 = arith.constant 0 : index
    %c0_13 = arith.constant 0 : index
    %13 = vector.load %arg17[%c0_11, %c0_12, %c0_13] : memref<2x1x128xf32, #tpu.memory_space<vmem>>, vector<1x1x128xf32>
    %14 = vector.shape_cast %13 : vector<1x1x128xf32> to vector<1x128xf32>
    %c0_14 = arith.constant 0 : index
    %c0_15 = arith.constant 0 : index
    %15 = vector.load %arg2[%c0_14, %c0_15] : memref<128x128xf32, #tpu.memory_space<vmem>>, vector<128x128xf32>
    %cst = arith.constant dense<0.000000e+00> : vector<8x128xf32>
    %16 = tpu.matmul %6, %15, %cst {dimension_numbers = #tpu.dot_dimension_numbers<[1], [0], [0], [1], [0, 0, 1, 1], [], []>} : vector<8x128xf32>, vector<128x128xf32>, vector<8x128xf32> -> vector<8x128xf32>
    %c0_16 = arith.constant 0 : index
    %c0_17 = arith.constant 0 : index
    %17 = vector.load %arg3[%c0_16, %c0_17] : memref<1x128xf32, #tpu.memory_space<vmem>>, vector<1x128xf32>
    %18 = vector.broadcast %17 : vector<1x128xf32> to vector<8x128xf32>
    %19 = arith.addf %16, %18 : vector<8x128xf32>
    %20 = vector.shape_cast %19 : vector<8x128xf32> to vector<1x8x128xf32>
    %c0_18 = arith.constant 0 : index
    %c0_19 = arith.constant 0 : index
    %21 = vector.load %arg4[%c0_18, %c0_19] : memref<128x128xf32, #tpu.memory_space<vmem>>, vector<128x128xf32>
    %cst_20 = arith.constant dense<0.000000e+00> : vector<8x128xf32>
    %22 = tpu.matmul %6, %21, %cst_20 {dimension_numbers = #tpu.dot_dimension_numbers<[1], [0], [0], [1], [0, 0, 1, 1], [], []>} : vector<8x128xf32>, vector<128x128xf32>, vector<8x128xf32> -> vector<8x128xf32>
    %c0_21 = arith.constant 0 : index
    %c0_22 = arith.constant 0 : index
    %23 = vector.load %arg5[%c0_21, %c0_22] : memref<1x128xf32, #tpu.memory_space<vmem>>, vector<1x128xf32>
    %24 = vector.broadcast %23 : vector<1x128xf32> to vector<8x128xf32>
    %25 = arith.addf %22, %24 : vector<8x128xf32>
    %26 = vector.shape_cast %25 : vector<8x128xf32> to vector<1x8x128xf32>
    %c0_23 = arith.constant 0 : index
    %c0_24 = arith.constant 0 : index
    %27 = vector.load %arg6[%c0_23, %c0_24] : memref<128x128xf32, #tpu.memory_space<vmem>>, vector<128x128xf32>
    %cst_25 = arith.constant dense<0.000000e+00> : vector<8x128xf32>
    %28 = tpu.matmul %6, %27, %cst_25 {dimension_numbers = #tpu.dot_dimension_numbers<[1], [0], [0], [1], [0, 0, 1, 1], [], []>} : vector<8x128xf32>, vector<128x128xf32>, vector<8x128xf32> -> vector<8x128xf32>
    %c0_26 = arith.constant 0 : index
    %c0_27 = arith.constant 0 : index
    %29 = vector.load %arg7[%c0_26, %c0_27] : memref<1x128xf32, #tpu.memory_space<vmem>>, vector<1x128xf32>
    %30 = vector.broadcast %29 : vector<1x128xf32> to vector<8x128xf32>
    %31 = arith.addf %28, %30 : vector<8x128xf32>
    %32 = vector.shape_cast %31 : vector<8x128xf32> to vector<1x8x128xf32>
    "tpu.trace_start"() <{level = 10 : i32, message = "bqd,bkd->bqk"}> : () -> ()
    %cst_28 = arith.constant dense<0.000000e+00> : vector<1x8x8xf32>
    %33 = tpu.matmul %20, %26, %cst_28 {dimension_numbers = #tpu.dot_dimension_numbers<[2], [2], [1], [1], [0, 0, 0, 1, 1, 1], [0], [0]>} : vector<1x8x128xf32>, vector<1x8x128xf32>, vector<1x8x8xf32> -> vector<1x8x8xf32>
    "tpu.trace_stop"() : () -> ()
    %cst_29 = arith.constant dense<0xFF800000> : vector<1x8xf32>
    %34 = vector.multi_reduction <maximumf>, %33, %cst_29 [2] : vector<1x8x8xf32> to vector<1x8xf32>
    %35 = vector.shape_cast %34 : vector<1x8xf32> to vector<1x8x1xf32>
    %36 = vector.broadcast %35 : vector<1x8x1xf32> to vector<1x8x8xf32>
    %37 = arith.subf %33, %36 : vector<1x8x8xf32>
    %38 = math.exp %37 : vector<1x8x8xf32>
    %cst_30 = arith.constant dense<0.000000e+00> : vector<1x8xf32>
    %39 = vector.multi_reduction <add>, %38, %cst_30 [2] : vector<1x8x8xf32> to vector<1x8xf32>
    %40 = vector.shape_cast %39 : vector<1x8xf32> to vector<1x8x1xf32>
    %41 = tpu.reciprocal %40 {approx = true} : vector<1x8x1xf32> -> vector<1x8x1xf32>
    %42 = vector.broadcast %41 : vector<1x8x1xf32> to vector<1x8x8xf32>
    %43 = arith.mulf %38, %42 : vector<1x8x8xf32>
    "tpu.trace_start"() <{level = 10 : i32, message = "bqk,bkd->bqd"}> : () -> ()
    %cst_31 = arith.constant dense<0.000000e+00> : vector<1x8x128xf32>
    %44 = tpu.matmul %43, %32, %cst_31 {dimension_numbers = #tpu.dot_dimension_numbers<[2], [1], [1], [2], [0, 0, 0, 1, 1, 2], [0], [0]>} : vector<1x8x8xf32>, vector<1x8x128xf32>, vector<1x8x128xf32> -> vector<1x8x128xf32>
    "tpu.trace_stop"() : () -> ()
    %45 = vector.shape_cast %44 : vector<1x8x128xf32> to vector<8x128xf32>
    %c0_32 = arith.constant 0 : index
    %c0_33 = arith.constant 0 : index
    %46 = vector.load %arg8[%c0_32, %c0_33] : memref<128x128xf32, #tpu.memory_space<vmem>>, vector<128x128xf32>
    %cst_34 = arith.constant dense<0.000000e+00> : vector<8x128xf32>
    %47 = tpu.matmul %45, %46, %cst_34 {dimension_numbers = #tpu.dot_dimension_numbers<[1], [0], [0], [1], [0, 0, 1, 1], [], []>} : vector<8x128xf32>, vector<128x128xf32>, vector<8x128xf32> -> vector<8x128xf32>
    %c0_35 = arith.constant 0 : index
    %c0_36 = arith.constant 0 : index
    %48 = vector.load %arg9[%c0_35, %c0_36] : memref<1x128xf32, #tpu.memory_space<vmem>>, vector<1x128xf32>
    %49 = vector.broadcast %48 : vector<1x128xf32> to vector<8x128xf32>
    %50 = arith.addf %47, %49 : vector<8x128xf32>
    %51 = arith.addf %6, %50 : vector<8x128xf32>
    %cst_37 = arith.constant dense<0.000000e+00> : vector<8xf32>
    %52 = vector.multi_reduction <add>, %51, %cst_37 [1] : vector<8x128xf32> to vector<8xf32>
    %53 = vector.shape_cast %52 : vector<8xf32> to vector<8x1xf32>
    %cst_38 = arith.constant 3.125000e-02 : f32
    %54 = vector.broadcast %cst_38 : f32 to vector<8x1xf32>
    %55 = arith.mulf %53, %54 : vector<8x1xf32>
    %56 = vector.broadcast %55 : vector<8x1xf32> to vector<8x128xf32>
    %57 = arith.subf %51, %56 : vector<8x128xf32>
    %58 = vector.broadcast %4 : vector<1x128xf32> to vector<8x128xf32>
    %59 = arith.mulf %57, %58 : vector<8x128xf32>
    %60 = arith.mulf %59, %59 : vector<8x128xf32>
    %cst_39 = arith.constant dense<0.000000e+00> : vector<8xf32>
    %61 = vector.multi_reduction <add>, %60, %cst_39 [1] : vector<8x128xf32> to vector<8xf32>
    %62 = vector.shape_cast %61 : vector<8xf32> to vector<8x1xf32>
    %cst_40 = arith.constant 0.0322580636 : f32
    %63 = vector.broadcast %cst_40 : f32 to vector<8x1xf32>
    %64 = arith.mulf %62, %63 : vector<8x1xf32>
    %65 = math.sqrt %64 : vector<8x1xf32>
    %cst_41 = arith.constant 9.99999997E-7 : f32
    %66 = vector.broadcast %cst_41 : f32 to vector<8x1xf32>
    %67 = arith.addf %65, %66 : vector<8x1xf32>
    %68 = tpu.reciprocal %67 {approx = true} : vector<8x1xf32> -> vector<8x1xf32>
    %69 = vector.broadcast %8 : vector<1x128xf32> to vector<8x128xf32>
    %70 = arith.mulf %69, %57 : vector<8x128xf32>
    %71 = vector.broadcast %68 : vector<8x1xf32> to vector<8x128xf32>
    %72 = arith.mulf %70, %71 : vector<8x128xf32>
    %73 = vector.broadcast %10 : vector<1x128xf32> to vector<8x128xf32>
    %74 = arith.addf %72, %73 : vector<8x128xf32>
    %c0_42 = arith.constant 0 : index
    %c0_43 = arith.constant 0 : index
    %75 = vector.load %arg10[%c0_42, %c0_43] : memref<128x128xf32, #tpu.memory_space<vmem>>, vector<128x128xf32>
    %cst_44 = arith.constant dense<0.000000e+00> : vector<8x128xf32>
    %76 = tpu.matmul %74, %75, %cst_44 {dimension_numbers = #tpu.dot_dimension_numbers<[1], [0], [0], [1], [0, 0, 1, 1], [], []>} : vector<8x128xf32>, vector<128x128xf32>, vector<8x128xf32> -> vector<8x128xf32>
    %c0_45 = arith.constant 0 : index
    %c0_46 = arith.constant 0 : index
    %77 = vector.load %arg11[%c0_45, %c0_46] : memref<1x128xf32, #tpu.memory_space<vmem>>, vector<1x128xf32>
    %78 = vector.broadcast %77 : vector<1x128xf32> to vector<8x128xf32>
    %79 = arith.addf %76, %78 : vector<8x128xf32>
    %cst_47 = arith.constant 0.000000e+00 : f32
    %80 = vector.broadcast %cst_47 : f32 to vector<8x128xf32>
    %81 = arith.maximumf %79, %80 : vector<8x128xf32>
    %c0_48 = arith.constant 0 : index
    %c0_49 = arith.constant 0 : index
    %82 = vector.load %arg12[%c0_48, %c0_49] : memref<128x128xf32, #tpu.memory_space<vmem>>, vector<128x128xf32>
    %cst_50 = arith.constant dense<0.000000e+00> : vector<8x128xf32>
    %83 = tpu.matmul %81, %82, %cst_50 {dimension_numbers = #tpu.dot_dimension_numbers<[1], [0], [0], [1], [0, 0, 1, 1], [], []>} : vector<8x128xf32>, vector<128x128xf32>, vector<8x128xf32> -> vector<8x128xf32>
    %c0_51 = arith.constant 0 : index
    %c0_52 = arith.constant 0 : index
    %84 = vector.load %arg13[%c0_51, %c0_52] : memref<1x128xf32, #tpu.memory_space<vmem>>, vector<1x128xf32>
    %85 = vector.broadcast %84 : vector<1x128xf32> to vector<8x128xf32>
    %86 = arith.addf %83, %85 : vector<8x128xf32>
    %87 = arith.addf %74, %86 : vector<8x128xf32>
    %cst_53 = arith.constant dense<0.000000e+00> : vector<8xf32>
    %88 = vector.multi_reduction <add>, %87, %cst_53 [1] : vector<8x128xf32> to vector<8xf32>
    %89 = vector.shape_cast %88 : vector<8xf32> to vector<8x1xf32>
    %cst_54 = arith.constant 3.125000e-02 : f32
    %90 = vector.broadcast %cst_54 : f32 to vector<8x1xf32>
    %91 = arith.mulf %89, %90 : vector<8x1xf32>
    %92 = vector.broadcast %91 : vector<8x1xf32> to vector<8x128xf32>
    %93 = arith.subf %87, %92 : vector<8x128xf32>
    %94 = vector.broadcast %4 : vector<1x128xf32> to vector<8x128xf32>
    %95 = arith.mulf %93, %94 : vector<8x128xf32>
    %96 = arith.mulf %95, %95 : vector<8x128xf32>
    %cst_55 = arith.constant dense<0.000000e+00> : vector<8xf32>
    %97 = vector.multi_reduction <add>, %96, %cst_55 [1] : vector<8x128xf32> to vector<8xf32>
    %98 = vector.shape_cast %97 : vector<8xf32> to vector<8x1xf32>
    %cst_56 = arith.constant 0.0322580636 : f32
    %99 = vector.broadcast %cst_56 : f32 to vector<8x1xf32>
    %100 = arith.mulf %98, %99 : vector<8x1xf32>
    %101 = math.sqrt %100 : vector<8x1xf32>
    %cst_57 = arith.constant 9.99999997E-7 : f32
    %102 = vector.broadcast %cst_57 : f32 to vector<8x1xf32>
    %103 = arith.addf %101, %102 : vector<8x1xf32>
    %104 = tpu.reciprocal %103 {approx = true} : vector<8x1xf32> -> vector<8x1xf32>
    %105 = vector.broadcast %12 : vector<1x128xf32> to vector<8x128xf32>
    %106 = arith.mulf %105, %93 : vector<8x128xf32>
    %107 = vector.broadcast %104 : vector<8x1xf32> to vector<8x128xf32>
    %108 = arith.mulf %106, %107 : vector<8x128xf32>
    %109 = vector.broadcast %14 : vector<1x128xf32> to vector<8x128xf32>
    %110 = arith.addf %108, %109 : vector<8x128xf32>
    %c1 = arith.constant 1 : index
    %c0_58 = arith.constant 0 : index
    %c0_59 = arith.constant 0 : index
    %111 = vector.load %arg14[%c1, %c0_58, %c0_59] : memref<2x1x128xf32, #tpu.memory_space<vmem>>, vector<1x1x128xf32>
    %112 = vector.shape_cast %111 : vector<1x1x128xf32> to vector<1x128xf32>
    %c1_60 = arith.constant 1 : index
    %c0_61 = arith.constant 0 : index
    %c0_62 = arith.constant 0 : index
    %113 = vector.load %arg15[%c1_60, %c0_61, %c0_62] : memref<2x1x128xf32, #tpu.memory_space<vmem>>, vector<1x1x128xf32>
    %114 = vector.shape_cast %113 : vector<1x1x128xf32> to vector<1x128xf32>
    %c1_63 = arith.constant 1 : index
    %c0_64 = arith.constant 0 : index
    %c0_65 = arith.constant 0 : index
    %115 = vector.load %arg16[%c1_63, %c0_64, %c0_65] : memref<2x1x128xf32, #tpu.memory_space<vmem>>, vector<1x1x128xf32>
    %116 = vector.shape_cast %115 : vector<1x1x128xf32> to vector<1x128xf32>
    %c1_66 = arith.constant 1 : index
    %c0_67 = arith.constant 0 : index
    %c0_68 = arith.constant 0 : index
    %117 = vector.load %arg17[%c1_66, %c0_67, %c0_68] : memref<2x1x128xf32, #tpu.memory_space<vmem>>, vector<1x1x128xf32>
    %118 = vector.shape_cast %117 : vector<1x1x128xf32> to vector<1x128xf32>
    %c0_69 = arith.constant 0 : index
    %c0_70 = arith.constant 0 : index
    %119 = vector.load %arg2[%c0_69, %c0_70] : memref<128x128xf32, #tpu.memory_space<vmem>>, vector<128x128xf32>
    %cst_71 = arith.constant dense<0.000000e+00> : vector<8x128xf32>
    %120 = tpu.matmul %110, %119, %cst_71 {dimension_numbers = #tpu.dot_dimension_numbers<[1], [0], [0], [1], [0, 0, 1, 1], [], []>} : vector<8x128xf32>, vector<128x128xf32>, vector<8x128xf32> -> vector<8x128xf32>
    %c0_72 = arith.constant 0 : index
    %c0_73 = arith.constant 0 : index
    %121 = vector.load %arg3[%c0_72, %c0_73] : memref<1x128xf32, #tpu.memory_space<vmem>>, vector<1x128xf32>
    %122 = vector.broadcast %121 : vector<1x128xf32> to vector<8x128xf32>
    %123 = arith.addf %120, %122 : vector<8x128xf32>
    %124 = vector.shape_cast %123 : vector<8x128xf32> to vector<1x8x128xf32>
    %c0_74 = arith.constant 0 : index
    %c0_75 = arith.constant 0 : index
    %125 = vector.load %arg4[%c0_74, %c0_75] : memref<128x128xf32, #tpu.memory_space<vmem>>, vector<128x128xf32>
    %cst_76 = arith.constant dense<0.000000e+00> : vector<8x128xf32>
    %126 = tpu.matmul %110, %125, %cst_76 {dimension_numbers = #tpu.dot_dimension_numbers<[1], [0], [0], [1], [0, 0, 1, 1], [], []>} : vector<8x128xf32>, vector<128x128xf32>, vector<8x128xf32> -> vector<8x128xf32>
    %c0_77 = arith.constant 0 : index
    %c0_78 = arith.constant 0 : index
    %127 = vector.load %arg5[%c0_77, %c0_78] : memref<1x128xf32, #tpu.memory_space<vmem>>, vector<1x128xf32>
    %128 = vector.broadcast %127 : vector<1x128xf32> to vector<8x128xf32>
    %129 = arith.addf %126, %128 : vector<8x128xf32>
    %130 = vector.shape_cast %129 : vector<8x128xf32> to vector<1x8x128xf32>
    %c0_79 = arith.constant 0 : index
    %c0_80 = arith.constant 0 : index
    %131 = vector.load %arg6[%c0_79, %c0_80] : memref<128x128xf32, #tpu.memory_space<vmem>>, vector<128x128xf32>
    %cst_81 = arith.constant dense<0.000000e+00> : vector<8x128xf32>
    %132 = tpu.matmul %110, %131, %cst_81 {dimension_numbers = #tpu.dot_dimension_numbers<[1], [0], [0], [1], [0, 0, 1, 1], [], []>} : vector<8x128xf32>, vector<128x128xf32>, vector<8x128xf32> -> vector<8x128xf32>
    %c0_82 = arith.constant 0 : index
    %c0_83 = arith.constant 0 : index
    %133 = vector.load %arg7[%c0_82, %c0_83] : memref<1x128xf32, #tpu.memory_space<vmem>>, vector<1x128xf32>
    %134 = vector.broadcast %133 : vector<1x128xf32> to vector<8x128xf32>
    %135 = arith.addf %132, %134 : vector<8x128xf32>
    %136 = vector.shape_cast %135 : vector<8x128xf32> to vector<1x8x128xf32>
    "tpu.trace_start"() <{level = 10 : i32, message = "bqd,bkd->bqk"}> : () -> ()
    %cst_84 = arith.constant dense<0.000000e+00> : vector<1x8x8xf32>
    %137 = tpu.matmul %124, %130, %cst_84 {dimension_numbers = #tpu.dot_dimension_numbers<[2], [2], [1], [1], [0, 0, 0, 1, 1, 1], [0], [0]>} : vector<1x8x128xf32>, vector<1x8x128xf32>, vector<1x8x8xf32> -> vector<1x8x8xf32>
    "tpu.trace_stop"() : () -> ()
    %cst_85 = arith.constant dense<0xFF800000> : vector<1x8xf32>
    %138 = vector.multi_reduction <maximumf>, %137, %cst_85 [2] : vector<1x8x8xf32> to vector<1x8xf32>
    %139 = vector.shape_cast %138 : vector<1x8xf32> to vector<1x8x1xf32>
    %140 = vector.broadcast %139 : vector<1x8x1xf32> to vector<1x8x8xf32>
    %141 = arith.subf %137, %140 : vector<1x8x8xf32>
    %142 = math.exp %141 : vector<1x8x8xf32>
    %cst_86 = arith.constant dense<0.000000e+00> : vector<1x8xf32>
    %143 = vector.multi_reduction <add>, %142, %cst_86 [2] : vector<1x8x8xf32> to vector<1x8xf32>
    %144 = vector.shape_cast %143 : vector<1x8xf32> to vector<1x8x1xf32>
    %145 = tpu.reciprocal %144 {approx = true} : vector<1x8x1xf32> -> vector<1x8x1xf32>
    %146 = vector.broadcast %145 : vector<1x8x1xf32> to vector<1x8x8xf32>
    %147 = arith.mulf %142, %146 : vector<1x8x8xf32>
    "tpu.trace_start"() <{level = 10 : i32, message = "bqk,bkd->bqd"}> : () -> ()
    %cst_87 = arith.constant dense<0.000000e+00> : vector<1x8x128xf32>
    %148 = tpu.matmul %147, %136, %cst_87 {dimension_numbers = #tpu.dot_dimension_numbers<[2], [1], [1], [2], [0, 0, 0, 1, 1, 2], [0], [0]>} : vector<1x8x8xf32>, vector<1x8x128xf32>, vector<1x8x128xf32> -> vector<1x8x128xf32>
    "tpu.trace_stop"() : () -> ()
    %149 = vector.shape_cast %148 : vector<1x8x128xf32> to vector<8x128xf32>
    %c0_88 = arith.constant 0 : index
    %c0_89 = arith.constant 0 : index
    %150 = vector.load %arg8[%c0_88, %c0_89] : memref<128x128xf32, #tpu.memory_space<vmem>>, vector<128x128xf32>
    %cst_90 = arith.constant dense<0.000000e+00> : vector<8x128xf32>
    %151 = tpu.matmul %149, %150, %cst_90 {dimension_numbers = #tpu.dot_dimension_numbers<[1], [0], [0], [1], [0, 0, 1, 1], [], []>} : vector<8x128xf32>, vector<128x128xf32>, vector<8x128xf32> -> vector<8x128xf32>
    %c0_91 = arith.constant 0 : index
    %c0_92 = arith.constant 0 : index
    %152 = vector.load %arg9[%c0_91, %c0_92] : memref<1x128xf32, #tpu.memory_space<vmem>>, vector<1x128xf32>
    %153 = vector.broadcast %152 : vector<1x128xf32> to vector<8x128xf32>
    %154 = arith.addf %151, %153 : vector<8x128xf32>
    %155 = arith.addf %110, %154 : vector<8x128xf32>
    %cst_93 = arith.constant dense<0.000000e+00> : vector<8xf32>
    %156 = vector.multi_reduction <add>, %155, %cst_93 [1] : vector<8x128xf32> to vector<8xf32>
    %157 = vector.shape_cast %156 : vector<8xf32> to vector<8x1xf32>
    %cst_94 = arith.constant 3.125000e-02 : f32
    %158 = vector.broadcast %cst_94 : f32 to vector<8x1xf32>
    %159 = arith.mulf %157, %158 : vector<8x1xf32>
    %160 = vector.broadcast %159 : vector<8x1xf32> to vector<8x128xf32>
    %161 = arith.subf %155, %160 : vector<8x128xf32>
    %162 = vector.broadcast %4 : vector<1x128xf32> to vector<8x128xf32>
    %163 = arith.mulf %161, %162 : vector<8x128xf32>
    %164 = arith.mulf %163, %163 : vector<8x128xf32>
    %cst_95 = arith.constant dense<0.000000e+00> : vector<8xf32>
    %165 = vector.multi_reduction <add>, %164, %cst_95 [1] : vector<8x128xf32> to vector<8xf32>
    %166 = vector.shape_cast %165 : vector<8xf32> to vector<8x1xf32>
    %cst_96 = arith.constant 0.0322580636 : f32
    %167 = vector.broadcast %cst_96 : f32 to vector<8x1xf32>
    %168 = arith.mulf %166, %167 : vector<8x1xf32>
    %169 = math.sqrt %168 : vector<8x1xf32>
    %cst_97 = arith.constant 9.99999997E-7 : f32
    %170 = vector.broadcast %cst_97 : f32 to vector<8x1xf32>
    %171 = arith.addf %169, %170 : vector<8x1xf32>
    %172 = tpu.reciprocal %171 {approx = true} : vector<8x1xf32> -> vector<8x1xf32>
    %173 = vector.broadcast %112 : vector<1x128xf32> to vector<8x128xf32>
    %174 = arith.mulf %173, %161 : vector<8x128xf32>
    %175 = vector.broadcast %172 : vector<8x1xf32> to vector<8x128xf32>
    %176 = arith.mulf %174, %175 : vector<8x128xf32>
    %177 = vector.broadcast %114 : vector<1x128xf32> to vector<8x128xf32>
    %178 = arith.addf %176, %177 : vector<8x128xf32>
    %c0_98 = arith.constant 0 : index
    %c0_99 = arith.constant 0 : index
    %179 = vector.load %arg10[%c0_98, %c0_99] : memref<128x128xf32, #tpu.memory_space<vmem>>, vector<128x128xf32>
    %cst_100 = arith.constant dense<0.000000e+00> : vector<8x128xf32>
    %180 = tpu.matmul %178, %179, %cst_100 {dimension_numbers = #tpu.dot_dimension_numbers<[1], [0], [0], [1], [0, 0, 1, 1], [], []>} : vector<8x128xf32>, vector<128x128xf32>, vector<8x128xf32> -> vector<8x128xf32>
    %c0_101 = arith.constant 0 : index
    %c0_102 = arith.constant 0 : index
    %181 = vector.load %arg11[%c0_101, %c0_102] : memref<1x128xf32, #tpu.memory_space<vmem>>, vector<1x128xf32>
    %182 = vector.broadcast %181 : vector<1x128xf32> to vector<8x128xf32>
    %183 = arith.addf %180, %182 : vector<8x128xf32>
    %cst_103 = arith.constant 0.000000e+00 : f32
    %184 = vector.broadcast %cst_103 : f32 to vector<8x128xf32>
    %185 = arith.maximumf %183, %184 : vector<8x128xf32>
    %c0_104 = arith.constant 0 : index
    %c0_105 = arith.constant 0 : index
    %186 = vector.load %arg12[%c0_104, %c0_105] : memref<128x128xf32, #tpu.memory_space<vmem>>, vector<128x128xf32>
    %cst_106 = arith.constant dense<0.000000e+00> : vector<8x128xf32>
    %187 = tpu.matmul %185, %186, %cst_106 {dimension_numbers = #tpu.dot_dimension_numbers<[1], [0], [0], [1], [0, 0, 1, 1], [], []>} : vector<8x128xf32>, vector<128x128xf32>, vector<8x128xf32> -> vector<8x128xf32>
    %c0_107 = arith.constant 0 : index
    %c0_108 = arith.constant 0 : index
    %188 = vector.load %arg13[%c0_107, %c0_108] : memref<1x128xf32, #tpu.memory_space<vmem>>, vector<1x128xf32>
    %189 = vector.broadcast %188 : vector<1x128xf32> to vector<8x128xf32>
    %190 = arith.addf %187, %189 : vector<8x128xf32>
    %191 = arith.addf %178, %190 : vector<8x128xf32>
    %cst_109 = arith.constant dense<0.000000e+00> : vector<8xf32>
    %192 = vector.multi_reduction <add>, %191, %cst_109 [1] : vector<8x128xf32> to vector<8xf32>
    %193 = vector.shape_cast %192 : vector<8xf32> to vector<8x1xf32>
    %cst_110 = arith.constant 3.125000e-02 : f32
    %194 = vector.broadcast %cst_110 : f32 to vector<8x1xf32>
    %195 = arith.mulf %193, %194 : vector<8x1xf32>
    %196 = vector.broadcast %195 : vector<8x1xf32> to vector<8x128xf32>
    %197 = arith.subf %191, %196 : vector<8x128xf32>
    %198 = vector.broadcast %4 : vector<1x128xf32> to vector<8x128xf32>
    %199 = arith.mulf %197, %198 : vector<8x128xf32>
    %200 = arith.mulf %199, %199 : vector<8x128xf32>
    %cst_111 = arith.constant dense<0.000000e+00> : vector<8xf32>
    %201 = vector.multi_reduction <add>, %200, %cst_111 [1] : vector<8x128xf32> to vector<8xf32>
    %202 = vector.shape_cast %201 : vector<8xf32> to vector<8x1xf32>
    %cst_112 = arith.constant 0.0322580636 : f32
    %203 = vector.broadcast %cst_112 : f32 to vector<8x1xf32>
    %204 = arith.mulf %202, %203 : vector<8x1xf32>
    %205 = math.sqrt %204 : vector<8x1xf32>
    %cst_113 = arith.constant 9.99999997E-7 : f32
    %206 = vector.broadcast %cst_113 : f32 to vector<8x1xf32>
    %207 = arith.addf %205, %206 : vector<8x1xf32>
    %208 = tpu.reciprocal %207 {approx = true} : vector<8x1xf32> -> vector<8x1xf32>
    %209 = vector.broadcast %116 : vector<1x128xf32> to vector<8x128xf32>
    %210 = arith.mulf %209, %197 : vector<8x128xf32>
    %211 = vector.broadcast %208 : vector<8x1xf32> to vector<8x128xf32>
    %212 = arith.mulf %210, %211 : vector<8x128xf32>
    %213 = vector.broadcast %118 : vector<1x128xf32> to vector<8x128xf32>
    %214 = arith.addf %212, %213 : vector<8x128xf32>
    %215 = vector.shape_cast %214 : vector<8x128xf32> to vector<1x8x128xf32>
    %c0_114 = arith.constant 0 : index
    %c0_115 = arith.constant 0 : index
    %c0_116 = arith.constant 0 : index
    %216 = vector.load %arg18[%c0_114, %c0_115, %c0_116] : memref<1x8x128xf32, #tpu.memory_space<vmem>>, vector<1x8x128xf32>
    tpu.vector_store %arg18[%c0_114, %c0_115, %c0_116], %215 {strides = array<i32>} : memref<1x8x128xf32, #tpu.memory_space<vmem>>, vector<1x8x128xf32>,
    return
  }
  func.func @transform_0(%arg0: i32) -> (i32, i32, i32) {
    %c0_i32 = arith.constant 0 : i32
    %c0_i32_0 = arith.constant 0 : i32
    %c0_i32_1 = arith.constant 0 : i32
    return %arg0, %c0_i32, %c0_i32_0 : i32, i32, i32
  }
  func.func @transform_1(%arg0: i32) -> (i32, i32) {
    %c0_i32 = arith.constant 0 : i32
    %c0_i32_0 = arith.constant 0 : i32
    %c0_i32_1 = arith.constant 0 : i32
    return %c0_i32, %c0_i32_0 : i32, i32
  }
  func.func @transform_2(%arg0: i32) -> (i32, i32) {
    %c0_i32 = arith.constant 0 : i32
    %c0_i32_0 = arith.constant 0 : i32
    %c0_i32_1 = arith.constant 0 : i32
    return %c0_i32, %c0_i32_0 : i32, i32
  }
  func.func @transform_3(%arg0: i32) -> (i32, i32) {
    %c0_i32 = arith.constant 0 : i32
    %c0_i32_0 = arith.constant 0 : i32
    %c0_i32_1 = arith.constant 0 : i32
    return %c0_i32, %c0_i32_0 : i32, i32
  }
  func.func @transform_4(%arg0: i32) -> (i32, i32) {
    %c0_i32 = arith.constant 0 : i32
    %c0_i32_0 = arith.constant 0 : i32
    %c0_i32_1 = arith.constant 0 : i32
    return %c0_i32, %c0_i32_0 : i32, i32
  }
  func.func @transform_5(%arg0: i32) -> (i32, i32) {
    %c0_i32 = arith.constant 0 : i32
    %c0_i32_0 = arith.constant 0 : i32
    %c0_i32_1 = arith.constant 0 : i32
    return %c0_i32, %c0_i32_0 : i32, i32
  }
  func.func @transform_6(%arg0: i32) -> (i32, i32) {
    %c0_i32 = arith.constant 0 : i32
    %c0_i32_0 = arith.constant 0 : i32
    %c0_i32_1 = arith.constant 0 : i32
    return %c0_i32, %c0_i32_0 : i32, i32
  }
  func.func @transform_7(%arg0: i32) -> (i32, i32) {
    %c0_i32 = arith.constant 0 : i32
    %c0_i32_0 = arith.constant 0 : i32
    %c0_i32_1 = arith.constant 0 : i32
    return %c0_i32, %c0_i32_0 : i32, i32
  }
  func.func @transform_8(%arg0: i32) -> (i32, i32) {
    %c0_i32 = arith.constant 0 : i32
    %c0_i32_0 = arith.constant 0 : i32
    %c0_i32_1 = arith.constant 0 : i32
    return %c0_i32, %c0_i32_0 : i32, i32
  }
  func.func @transform_9(%arg0: i32) -> (i32, i32) {
    %c0_i32 = arith.constant 0 : i32
    %c0_i32_0 = arith.constant 0 : i32
    %c0_i32_1 = arith.constant 0 : i32
    return %c0_i32, %c0_i32_0 : i32, i32
  }
  func.func @transform_10(%arg0: i32) -> (i32, i32) {
    %c0_i32 = arith.constant 0 : i32
    %c0_i32_0 = arith.constant 0 : i32
    %c0_i32_1 = arith.constant 0 : i32
    return %c0_i32, %c0_i32_0 : i32, i32
  }
  func.func @transform_11(%arg0: i32) -> (i32, i32) {
    %c0_i32 = arith.constant 0 : i32
    %c0_i32_0 = arith.constant 0 : i32
    %c0_i32_1 = arith.constant 0 : i32
    return %c0_i32, %c0_i32_0 : i32, i32
  }
  func.func @transform_12(%arg0: i32) -> (i32, i32) {
    %c0_i32 = arith.constant 0 : i32
    %c0_i32_0 = arith.constant 0 : i32
    %c0_i32_1 = arith.constant 0 : i32
    return %c0_i32, %c0_i32_0 : i32, i32
  }
  func.func @transform_13(%arg0: i32) -> (i32, i32, i32) {
    %c0_i32 = arith.constant 0 : i32
    %c0_i32_0 = arith.constant 0 : i32
    %c0_i32_1 = arith.constant 0 : i32
    %c0_i32_2 = arith.constant 0 : i32
    return %c0_i32, %c0_i32_0, %c0_i32_1 : i32, i32, i32
  }
  func.func @transform_14(%arg0: i32) -> (i32, i32, i32) {
    %c0_i32 = arith.constant 0 : i32
    %c0_i32_0 = arith.constant 0 : i32
    %c0_i32_1 = arith.constant 0 : i32
    %c0_i32_2 = arith.constant 0 : i32
    return %c0_i32, %c0_i32_0, %c0_i32_1 : i32, i32, i32
  }
  func.func @transform_15(%arg0: i32) -> (i32, i32, i32) {
    %c0_i32 = arith.constant 0 : i32
    %c0_i32_0 = arith.constant 0 : i32
    %c0_i32_1 = arith.constant 0 : i32
    %c0_i32_2 = arith.constant 0 : i32
    return %c0_i32, %c0_i32_0, %c0_i32_1 : i32, i32, i32
  }
  func.func @transform_16(%arg0: i32) -> (i32, i32, i32) {
    %c0_i32 = arith.constant 0 : i32
    %c0_i32_0 = arith.constant 0 : i32
    %c0_i32_1 = arith.constant 0 : i32
    %c0_i32_2 = arith.constant 0 : i32
    return %c0_i32, %c0_i32_0, %c0_i32_1 : i32, i32, i32
  }
  func.func @transform_17(%arg0: i32) -> (i32, i32, i32) {
    %c0_i32 = arith.constant 0 : i32
    %c0_i32_0 = arith.constant 0 : i32
    %c0_i32_1 = arith.constant 0 : i32
    return %arg0, %c0_i32, %c0_i32_0 : i32, i32, i32
  }
}

</mosaic_0001>

<bundles_post_ra>
// kernel: encoder_forward.1
= control target key start
LH: loop header
LB: loop body
LE: loop exit
PB: predicated region body
PF: predicated region fallthrough
CT: control target
= control target key end

     0   :  { %s4194_s0 = inlined_call_operand.vmem [shape: f32[2,8,128], index: 0, kind: input, shape index: {}]   ;;  %s4195_s1 = inlined_call_operand.vmem [shape: f32[128,128], index: 1, kind: input, shape index: {}]   ;;  %s4196_s2 = inlined_call_operand.vmem [shape: f32[1,128], index: 2, kind: input, shape index: {}]   ;;  %s4197_s3 = inlined_call_operand.vmem [shape: f32[128,128], index: 3, kind: input, shape index: {}]   ;;  %s4198_s4 = inlined_call_operand.vmem [shape: f32[1,128], index: 4, kind: input, shape index: {}]   ;;  %s4199_s5 = inlined_call_operand.vmem [shape: f32[128,128], index: 5, kind: input, shape index: {}]   ;;  %s4200_s6 = inlined_call_operand.vmem [shape: f32[1,128], index: 6, kind: input, shape index: {}]   ;;  %s4201_s7 = inlined_call_operand.vmem [shape: f32[128,128], index: 7, kind: input, shape index: {}]   ;;  %s4202_s8 = inlined_call_operand.vmem [shape: f32[1,128], index: 8, kind: input, shape index: {}]   ;;  %s4203_s9 = inlined_call_operand.vmem [shape: f32[128,128], index: 9, kind: input, shape index: {}]   ;;  %s4204_s10 = inlined_call_operand.vmem [shape: f32[1,128], index: 10, kind: input, shape index: {}]   ;;  %s4205_s11 = inlined_call_operand.vmem [shape: f32[128,128], index: 11, kind: input, shape index: {}]   ;;  %s4206_s12 = inlined_call_operand.vmem [shape: f32[1,128], index: 12, kind: input, shape index: {}]   ;;  %s4207_s13 = inlined_call_operand.vmem [shape: f32[2,1,128], index: 13, kind: input, shape index: {}]   ;;  %s4208_s14 = inlined_call_operand.vmem [shape: f32[2,1,128], index: 14, kind: input, shape index: {}]   ;;  %s4209_s15 = inlined_call_operand.vmem [shape: f32[2,1,128], index: 15, kind: input, shape index: {}]   ;;  %s4210_s16 = inlined_call_operand.vmem [shape: f32[2,1,128], index: 16, kind: input, shape index: {}]   ;;  %s4211_s17 = inlined_call_operand.hbm [shape: f32[2,8,128], index: 17, kind: output, shape index: {}]  }
   0x1   :  { %4266 = sst [smem:[#allocation56_spill]] %s4194_s0 }
   0x2   :  { %4267 = sst [smem:[#allocation57_spill]] %s4195_s1 }
   0x3   :  { %4268 = sst [smem:[#allocation58_spill]] %s4196_s2 }
   0x4   :  { %4269 = sst [smem:[#allocation59_spill]] %s4197_s3 }
   0x5   :  { %4270 = sst [smem:[#allocation60_spill]] %s4198_s4 }
   0x6   :  { %4271 = sst [smem:[#allocation61_spill]] %s4199_s5 }
   0x7   :  { %22 = vsyncpa [#allocation3], 0 }
   0x8   :  { %24 = vsyncpa [#allocation3 + $0x1], 0  ;;  %s3108_s24 = smov 0   ;;  %s3110_s25 = smov 0  }
   0x9   :  { %s3112_s26 = smov 0   ;;  %s3114_s27 = smov 0  }
   0xa LB: > { %4272 = sst [smem:[#allocation5_spill]] %s3009_s26  ;;  %s3129_s28 = sadd.s32 4294967295, %s3013_s27   ;;  %s3013_s27 = sphi %s3114_s27, %s4380_s27   ;;  %s3009_s26 = sphi %s3112_s26, %s4382_s26   ;;  %s3005_s25 = sphi %s3110_s25, %s4384_s25   ;;  %s3001_s24 = sphi %s3108_s24, %s4383_s24  }
   0xb   : > { %s2199_s29 = sadd.s32 4294967294, %s3013_s27   ;;  %s3133_s0 = sadd.s32 1, %s3013_s27  }
   0xc   : > { %4273 = sst [smem:[#allocation6_spill]] %s3133_s0  ;;  %s399_s30 = sadd.s32 1, %s3009_s26 }
   0xd   : > { %s396_s18 = ssub.s32 %s3013_s27, %s3133_s0  ;;  %p409_p0 = scmp.ne.s32.totalorder %s3009_s26, %s3005_s25 }
   0xe   : > { %p397_p1 = scmp.eq.s32.totalorder %s396_s18, 0  ;;  %p410_p2 = scmp.eq.s32.totalorder %s3129_s28, 1 }
   0xf   : > { %p415_p3 = scmp.ne.s32.totalorder %s3005_s25, %s3001_s24  ;;  %p416_p4 = scmp.eq.s32.totalorder %s2199_s29, 1 }
  0x10   : > { %s3144_s19 = scalar_select %p397_p1, %s3009_s26, %s399_s30  }
  0x11   : > { %p3146_p5 = por %p410_p2, %p409_p0  ;;  %p3150_p6 = por %p416_p4, %p415_p3 }
  0x12   : > { %4274 = sst [smem:[#allocation7_spill]] %s3144_s19  ;;  %p2202_p7 = scmp.ge.s32.totalorder %s3013_s27, 1 }
  0x13   : > { %s4276_s20 = scalar_select %p3150_p6, 1, 0 }
  0x14   : > { %p489_p8 = scmp.lt.s32.totalorder %s3013_s27, 3 }
  0x15   : > { %4277 = sst [smem:[#allocation8_spill]] %s4276_s20 }
  0x16   : > { %p490_p9 = pnand %p2202_p7, %p489_p8 }
  0x18   : > { %493 = sbr.rel (%p490_p9) target bundleno = 4350 (0x10fe), region = 88 }
  0x1d   : > { %s4278_s3 = sld [smem:[#allocation59_spill]]  ;;  %v4264_v2 = vmov 0.0   ;;  %p540_p10 = scmp.lt.s32.totalorder %s3129_s28, 1  ;;  %vm3016_vm0 = vmmov 0   ;;  %v3532_v58 = vld [vmem:[%s4200_s6] ss:$0 sm:$0xff] }
  0x1e   : > { %s4279_s30 = sld [smem:[#allocation57_spill]]  ;;  %2483 = vmatprep.subr.mxu1 %v4264_v2  ;;  %2448 = vmatprep.subr.mxu0 %v4264_v2  ;;  %4286 = vst [vmem:[#allocation11_spill] sm:$0xff] %v3532_v58  ;;  %vm903_vm1 = vcmask 64512   ;;  %s537_s29 = sand.u32 1, %s3005_s25  }
  0x1f   : > { %s541_s21 = scalar_select %p540_p10, %s3129_s28, 1  ;;  %2515 = vmatprep.mubr.msk.f32.mxu1 %vm3016_vm0, %v4264_v2  ;;  %2480 = vmatprep.mubr.msk.f32.mxu0 %vm3016_vm0, %v4264_v2 }
  0x20   : > { %s4280_s22 = sld [smem:[#allocation56_spill]]  ;;  %s2233_s23 = sshll.u32 %s3129_s28, 7 }
  0x21   : > { %s2204_s19 = sshll.u32 %s541_s21, 3  ;;  %s4281_s5 = sld [smem:[#allocation61_spill]] }
  0x22   : > { %s4282_s4 = sld [smem:[#allocation60_spill]]  ;;  %s2127_s21 = scalar_lea.sflag [#allocation3], %s537_s29 }
  0x23   : > { %v3159_v0 = vld [vmem:[%s4278_s3 + $0x78] sm:$0xff]  ;;  %v3171_v3 = vld [vmem:[%s4278_s3 + $0x70] sm:$0xff]  ;;  %v3185_v5 = vld [vmem:[%s4278_s3 + $0x68] sm:$0xff]  ;;  %s4284_s2 = sld [smem:[#allocation58_spill]] }
  0x24   : > { %v3164_v1 = vld [vmem:[%s4279_s30 + $0x78] sm:$0xff]  ;;  %v3176_v4 = vld [vmem:[%s4279_s30 + $0x70] sm:$0xff]  ;;  %2484 = vmatpush3.msra.mxu1 %v3159_v0  ;;  %v3190_v6 = vld [vmem:[%s4279_s30 + $0x68] sm:$0xff] }
  0x25   : > { %2449 = vmatpush3.msra.mxu0 %v3164_v1  ;;  %2485 = vmatprep.subr.mxu1 %v4264_v2  ;;  %v3199_v7 = vld [vmem:[%s4278_s3 + $0x60] sm:$0xff]  ;;  %v3213_v9 = vld [vmem:[%s4278_s3 + $0x58] sm:$0xff]  ;;  %v3227_v11 = vld [vmem:[%s4278_s3 + $0x50] sm:$0xff] }
  0x26   : > { %2450 = vmatprep.subr.mxu0 %v4264_v2  ;;  %2486 = vmatpush3.msra.mxu1 %v3171_v3  ;;  %v3204_v8 = vld [vmem:[%s4279_s30 + $0x60] sm:$0xff]  ;;  %v3218_v10 = vld [vmem:[%s4279_s30 + $0x58] sm:$0xff]  ;;  %v3232_v12 = vld [vmem:[%s4279_s30 + $0x50] sm:$0xff]  ;;  %s543_s20 = scalar_lea.vmem %s4280_s22, %s2204_s19  ;;  %s2203_s19 = sshll.u32 %s537_s29, 3 }
  0x27   : > { %2451 = vmatpush3.msra.mxu0 %v3176_v4  ;;  %2487 = vmatprep.subr.mxu1 %v4264_v2  ;;  %v3241_v13 = vld [vmem:[%s4278_s3 + $0x48] sm:$0xff]  ;;  %v3255_v15 = vld [vmem:[%s4278_s3 + $0x40] sm:$0xff]  ;;  %v3269_v17 = vld [vmem:[%s4278_s3 + $0x38] sm:$0xff]  ;;  %s539_s26 = scalar_lea.vmem [#allocation2], %s2203_s19 }
  0x28   : > { %2452 = vmatprep.subr.mxu0 %v4264_v2  ;;  %2488 = vmatpush3.msra.mxu1 %v3185_v5  ;;  %v3246_v14 = vld [vmem:[%s4279_s30 + $0x48] sm:$0xff]  ;;  %v3260_v16 = vld [vmem:[%s4279_s30 + $0x40] sm:$0xff]  ;;  %v3274_v18 = vld [vmem:[%s4279_s30 + $0x38] sm:$0xff]  ;;  %s2140_s0 = sshll.u32 %s539_s26, 4  ;;  %s2141_s0 = int_to_ptr.vmem [resolvable:$true] %s2140_s0 }
  0x29   : > { %2453 = vmatpush3.msra.mxu0 %v3190_v6  ;;  %2489 = vmatprep.subr.mxu1 %v4264_v2  ;;  %v3283_v19 = vld [vmem:[%s4278_s3 + $0x30] sm:$0xff]  ;;  %v3298_v21 = vld [vmem:[%s4278_s3 + $0x28] sm:$0xff]  ;;  %v3312_v23 = vld [vmem:[%s4278_s3 + $0x20] sm:$0xff] }
  0x2a   : > { %2454 = vmatprep.subr.mxu0 %v4264_v2  ;;  %2490 = vmatpush3.msra.mxu1 %v3199_v7  ;;  %v3288_v20 = vld [vmem:[%s4279_s30 + $0x30] sm:$0xff]  ;;  %v3303_v22 = vld [vmem:[%s4279_s30 + $0x28] sm:$0xff]  ;;  %v3317_v24 = vld [vmem:[%s4279_s30 + $0x20] sm:$0xff] }
  0x2b   : > { %2455 = vmatpush3.msra.mxu0 %v3204_v8  ;;  %2491 = vmatprep.subr.mxu1 %v4264_v2  ;;  %v3327_v25 = vld [vmem:[%s4278_s3 + $0x18] sm:$0xff]  ;;  %v3341_v27 = vld [vmem:[%s4278_s3 + $0x10] sm:$0xff]  ;;  %v3355_v29 = vld [vmem:[%s4278_s3 + $0x8] sm:$0xff] }
  0x2c   : > { %2456 = vmatprep.subr.mxu0 %v4264_v2  ;;  %2492 = vmatpush3.msra.mxu1 %v3213_v9  ;;  %v3332_v26 = vld [vmem:[%s4279_s30 + $0x18] sm:$0xff]  ;;  %v3346_v28 = vld [vmem:[%s4279_s30 + $0x10] sm:$0xff]  ;;  %v3360_v30 = vld [vmem:[%s4279_s30 + $0x8] sm:$0xff] }
  0x2d   : > { %2457 = vmatpush3.msra.mxu0 %v3218_v10  ;;  %2493 = vmatprep.subr.mxu1 %v4264_v2  ;;  %v3372_v31 = vld [vmem:[%s4278_s3] sm:$0xff]  ;;  %v3394_v34 = vld [vmem:[%s4281_s5 + $0x78] sm:$0xff]  ;;  %v3402_v35 = vld [vmem:[%s4281_s5 + $0x70] sm:$0xff] }
  0x2e   : > { %2458 = vmatprep.subr.mxu0 %v4264_v2  ;;  %2494 = vmatpush3.msra.mxu1 %v3227_v11  ;;  %v3379_v32 = vld [vmem:[%s4279_s30] sm:$0xff]  ;;  %v3412_v36 = vld [vmem:[%s4281_s5 + $0x68] sm:$0xff]  ;;  %v3428_v38 = vld [vmem:[%s4281_s5 + $0x58] sm:$0xff] }
  0x2f   : > { %2459 = vmatpush3.msra.mxu0 %v3232_v12  ;;  %2495 = vmatprep.subr.mxu1 %v4264_v2  ;;  %v3383_v33 = vld [vmem:[%s543_s20] sm:$0xff]  ;;  %v3435_v39 = vld [vmem:[%s4281_s5 + $0x50] sm:$0xff]  ;;  %v3442_v40 = vld [vmem:[%s4281_s5 + $0x48] sm:$0xff]  ;;  %s2953_s20 = scalar_lea.vmem %s2141_s0, 128 }
  0x30   : > { %2460 = vmatprep.subr.mxu0 %v4264_v2  ;;  %2496 = vmatpush3.msra.mxu1 %v3241_v13  ;;  %v3421_v37 = vld [vmem:[%s4281_s5 + $0x60] sm:$0xff]  ;;  %v3456_v42 = vld [vmem:[%s4281_s5 + $0x38] sm:$0xff]  ;;  %v3463_v43 = vld [vmem:[%s4281_s5 + $0x30] sm:$0xff]  ;;  %p2954_p11 = scmp.ne.s32.totalorder %s2141_s0, %s2953_s20 }
  0x31   : > { %2461 = vmatpush3.msra.mxu0 %v3246_v14  ;;  %2497 = vmatprep.subr.mxu1 %v4264_v2  ;;  %v3449_v41 = vld [vmem:[%s4281_s5 + $0x40] sm:$0xff]  ;;  %v3470_v44 = vld [vmem:[%s4281_s5 + $0x28] sm:$0xff]  ;;  %v3484_v46 = vld [vmem:[%s4281_s5 + $0x18] sm:$0xff] }
  0x32   : > { %2462 = vmatprep.subr.mxu0 %v4264_v2  ;;  %2498 = vmatpush3.msra.mxu1 %v3255_v15  ;;  %v3477_v45 = vld [vmem:[%s4281_s5 + $0x20] sm:$0xff]  ;;  %v3491_v47 = vld [vmem:[%s4281_s5 + $0x10] sm:$0xff]  ;;  %v3498_v48 = vld [vmem:[%s4281_s5 + $0x8] sm:$0xff]  ;;  %p2955_p12 = pnand %p2954_p11, %p3146_p5 }
  0x33   : > { %2463 = vmatpush3.msra.mxu0 %v3260_v16  ;;  %2499 = vmatprep.subr.mxu1 %v4264_v2  ;;  %v3505_v49 = vld [vmem:[%s4281_s5] sm:$0xff]  ;;  %s3017_s5 = smov [#allocation2]  }
  0x34   : > { %2464 = vmatprep.subr.mxu0 %v4264_v2  ;;  %2500 = vmatpush3.msra.mxu1 %v3269_v17  ;;  %v3517_v50 = vld [vmem:[%s4282_s4] ss:$0 sm:$0xff]  ;;  %s2138_s4 = scalar_lea.hbm %s4211_s17, %s2233_s23  ;;  %p2956_p13 = pneg %p2955_p12 }
  0x35   : > { %2465 = vmatpush3.msra.mxu0 %v3274_v18  ;;  %2501 = vmatprep.subr.mxu1 %v4264_v2  ;;  %4283 = vst [vmem:[#allocation9_spill] sm:$0xff] %v3517_v50  ;;  %v3522_v51 = vld [vmem:[%s4284_s2] ss:$0 sm:$0xff]  ;;  %s2957_s18 = sshll.u32 %s3017_s5, 4  ;;  %s2958_s18 = int_to_ptr.vmem [resolvable:$false] %s2957_s18 }
  0x36   : > { %2466 = vmatprep.subr.mxu0 %v4264_v2  ;;  %2502 = vmatpush3.msra.mxu1 %v3283_v19  ;;  %4285 = vst [vmem:[#allocation10_spill] sm:$0xff] %v3522_v51  ;;  %s2959_s28 = scalar_lea.vmem %s2958_s18, 256  ;;  %p2960_p0 = scmp.lt.s32.totalorder %s2141_s0, %s2958_s18 }
  0x37   : > { %2467 = vmatpush3.msra.mxu0 %v3288_v20  ;;  %2503 = vmatprep.subr.mxu1 %v4264_v2  ;;  %p2961_p1 = scmp.lt.s32.totalorder %s2959_s28, %s2953_s20 }
  0x38   : > { %2468 = vmatprep.subr.mxu0 %v4264_v2  ;;  %2504 = vmatpush3.msra.mxu1 %v3298_v21 }
  0x39   : > { %2469 = vmatpush3.msra.mxu0 %v3303_v22  ;;  %2505 = vmatprep.subr.mxu1 %v4264_v2  ;;  %p2962_p2 = por %p2961_p1, %p2960_p0 }
  0x3a   : > { %2470 = vmatprep.subr.mxu0 %v4264_v2  ;;  %2506 = vmatpush3.msra.mxu1 %v3312_v23 }
  0x3b   : > { %2471 = vmatpush3.msra.mxu0 %v3317_v24  ;;  %2507 = vmatprep.subr.mxu1 %v4264_v2  ;;  %p2963_p3 = pnand %p2962_p2, %p2956_p13 }
  0x3c   : > { %2472 = vmatprep.subr.mxu0 %v4264_v2  ;;  %2508 = vmatpush3.msra.mxu1 %v3327_v25 }
  0x3d   : > { %2473 = vmatpush3.msra.mxu0 %v3332_v26  ;;  %2509 = vmatprep.subr.mxu1 %v4264_v2 }
  0x3e   : > { %2474 = vmatprep.subr.mxu0 %v4264_v2  ;;  %2510 = vmatpush3.msra.mxu1 %v3341_v27 }
  0x3f   : > { %2475 = vmatpush3.msra.mxu0 %v3346_v28  ;;  %2511 = vmatprep.subr.mxu1 %v4264_v2 }
  0x40   : > { %2476 = vmatprep.subr.mxu0 %v4264_v2  ;;  %2512 = vmatpush3.msra.mxu1 %v3355_v29 }
  0x41   : > { %2477 = vmatpush3.msra.mxu0 %v3360_v30  ;;  %2513 = vmatprep.subr.mxu1 %v4264_v2 }
  0x42   : > { %2478 = vmatprep.subr.mxu0 %v4264_v2  ;;  %2514 = vmatpush3.msra.mxu1 %v3372_v31 }
  0x43   : > { %2479 = vmatpush3.msra.mxu0 %v3379_v32  ;;  %2516 = vmatmul.mubr.f32.vlgmr.msra.gmra.mxu1 %v3383_v33 }
  0x44   : > { %2481 = vmatmul.mubr.f32.vlgmr.msra.gmra.mxu0 %v3383_v33  ;;  %2518 = vmatprep.subr.mxu0 %v4264_v2 }
  0x45   : > { %2550 = vmatprep.mubr.msk.f32.mxu0 %vm3016_vm0, %v4264_v2  ;;  %2519 = vmatpush3.msra.mxu0 %v3394_v34 }
  0x46   : > { %2563 = vmatprep.subr.mxu1 %v4264_v2  ;;  %2520 = vmatprep.subr.mxu0 %v4264_v2 }
  0x47   : > { %2595 = vmatprep.mubr.msk.f32.mxu1 %vm3016_vm0, %v4264_v2  ;;  %2521 = vmatpush3.msra.mxu0 %v3402_v35 }
  0x48   : > { %2522 = vmatprep.subr.mxu0 %v4264_v2 }
  0x49   : > { %2523 = vmatpush3.msra.mxu0 %v3412_v36 }
  0x4a   : > { %2524 = vmatprep.subr.mxu0 %v4264_v2 }
  0x4b   : > { %2525 = vmatpush3.msra.mxu0 %v3421_v37 }
  0x4c   : > { %2526 = vmatprep.subr.mxu0 %v4264_v2 }
  0x4d   : > { %2527 = vmatpush3.msra.mxu0 %v3428_v38 }
  0x4e   : > { %2528 = vmatprep.subr.mxu0 %v4264_v2 }
  0x4f   : > { %2529 = vmatpush3.msra.mxu0 %v3435_v39 }
  0x50   : > { %2530 = vmatprep.subr.mxu0 %v4264_v2 }
  0x51   : > { %2531 = vmatpush3.msra.mxu0 %v3442_v40 }
  0x52   : > { %2532 = vmatprep.subr.mxu0 %v4264_v2 }
  0x53   : > { %2533 = vmatpush3.msra.mxu0 %v3449_v41 }
  0x54   : > { %2534 = vmatprep.subr.mxu0 %v4264_v2 }
  0x55   : > { %2535 = vmatpush3.msra.mxu0 %v3456_v42 }
  0x56   : > { %2536 = vmatprep.subr.mxu0 %v4264_v2 }
  0x57   : > { %2537 = vmatpush3.msra.mxu0 %v3463_v43 }
  0x58   : > { %2538 = vmatprep.subr.mxu0 %v4264_v2 }
  0x59   : > { %2539 = vmatpush3.msra.mxu0 %v3470_v44 }
  0x5a   : > { %2540 = vmatprep.subr.mxu0 %v4264_v2 }
  0x5b   : > { %2541 = vmatpush3.msra.mxu0 %v3477_v45 }
  0x5c   : > { %2542 = vmatprep.subr.mxu0 %v4264_v2 }
  0x5d   : > { %2543 = vmatpush3.msra.mxu0 %v3484_v46 }
  0x5e   : > { %2544 = vmatprep.subr.mxu0 %v4264_v2 }
  0x5f   : > { %2545 = vmatpush3.msra.mxu0 %v3491_v47 }
  0x60   : > { %2546 = vmatprep.subr.mxu0 %v4264_v2 }
  0x61   : > { %2547 = vmatpush3.msra.mxu0 %v3498_v48 }
  0x62   : > { %2548 = vmatprep.subr.mxu0 %v4264_v2 }
  0x63   : > { %2549 = vmatpush3.msra.mxu0 %v3505_v49 }
  0x64   : > { %2551 = vmatmul.mubr.f32.vlgmr.msra.gmra.mxu0 %v3383_v33  ;;  %2553 = vmatprep.subr.mxu0 %v4264_v2 }
  0x65   : > { %2555 = vmatprep.mubr.msk.f32.mxu0 %vm3016_vm0, %v4264_v2 }
 0x103   : > { %v736_v52 = vpop.f32.mrf.mxu1 }
 0x104   : > { %v643_v53 = vpop.f32.mrf.mxu0  ;;  %v737_v54 = vadd.f32 %v3517_v50, %v736_v52  ;;  %v3754_v50 = vld [vmem:[%s4203_s9 + $0x18] sm:$0xff] }
 0x105   : > { %v644_v55 = vadd.f32 %v3522_v51, %v643_v53  ;;  %v2517_v56 = vpop.f32.mrf.mxu1  ;;  %4314 = vst [vmem:[#allocation39_spill] sm:$0xff] %v3754_v50 }
 0x106   : > { %v2482_v57 = vpop.f32.mrf.mxu0  ;;  %2554 = vmatpush3.xpose.msra.mxu0 %v737_v54 }
 0x107   : > { %2558 = vmatprep.subr.mxu0 %v4264_v2 }
 0x109   : > { %2556 = vmatmul.mubr.f32.vlgmr.msra.gmra.mxu0 %v644_v55 }
 0x10a   : > { %2560 = vmatprep.mubr.msk.f32.mxu0 %vm3016_vm0, %v4264_v2 }
 0x124   : > { %v829_v59 = vpop.f32.mrf.mxu0 }
 0x125   : > { %v830_v60 = vadd.f32 %v3532_v58, %v829_v59  ;;  %v3541_v59 = vld [vmem:[%s4201_s7 + $0x78] sm:$0xff] }
 0x126   : > { %v2552_v61 = vpop.f32.mrf.mxu0  ;;  %4287 = vst [vmem:[#allocation12_spill] sm:$0xff] %v3541_v59  ;;  %2564 = vmatpush3.msra.mxu1 %v3541_v59 }
 0x127   : > { %2559 = vmatpush3.msra.mxu0 %v830_v60  ;;  %v3546_v60 = vld [vmem:[%s4201_s7 + $0x70] sm:$0xff]  ;;  %2565 = vmatprep.subr.mxu1 %v4264_v2  ;;  %v3553_v61 = vld [vmem:[%s4201_s7 + $0x68] sm:$0xff] }
 0x128   : > { %2598 = vmatprep.subr.mxu0 %v4264_v2  ;;  %4288 = vst [vmem:[#allocation13_spill] sm:$0xff] %v3546_v60  ;;  %4289 = vst [vmem:[#allocation14_spill] sm:$0xff] %v3553_v61  ;;  %2566 = vmatpush3.msra.mxu1 %v3546_v60 }
 0x129   : > { %2567 = vmatprep.subr.mxu1 %v4264_v2 }
 0x12a   : > { %2568 = vmatpush3.msra.mxu1 %v3553_v61 }
 0x12b   : > { %2569 = vmatprep.subr.mxu1 %v4264_v2 }
 0x1c9   : > { %v899_v62 = vpop.f32.mrf.mxu0 }
 0x1ca   : > { %v904_v63 = vsel %vm903_vm1, %v899_v62, -inf }
 0x1cb   : > { %905 = vmax.xlane.f32.xlu0 %v904_v63  ;;  %v2557_v52 = vpop.f32.mrf.mxu0  ;;  %v3567_v63 = vld [vmem:[%s4201_s7 + $0x58] sm:$0xff] }
 0x1cc   : > { %4291 = vst [vmem:[#allocation16_spill] sm:$0xff] %v3567_v63  ;;  %v3574_v52 = vld [vmem:[%s4201_s7 + $0x50] sm:$0xff] }
 0x1cd   : > { %4292 = vst [vmem:[#allocation17_spill] sm:$0xff] %v3574_v52 }
 0x254   : > { %v906_v53 = vpop.xlane.xlu0 %905 }
 0x255   : > { %v907_v54 = vsub.f32 %v899_v62, %v906_v53  ;;  %v3560_v62 = vld [vmem:[%s4201_s7 + $0x60] sm:$0xff]  ;;  %v3581_v53 = vld [vmem:[%s4201_s7 + $0x48] sm:$0xff] }
 0x256   : > { %4290 = vst [vmem:[#allocation15_spill] sm:$0xff] %v3560_v62  ;;  %2570 = vmatpush3.msra.mxu1 %v3560_v62  ;;  %4293 = vst [vmem:[#allocation18_spill] sm:$0xff] %v3581_v53 }
 0x257   : > { %v908_v55 = vmul.f32 1.442695, %v907_v54  ;;  %2571 = vmatprep.subr.mxu1 %v4264_v2  ;;  %v3588_v54 = vld [vmem:[%s4201_s7 + $0x40] sm:$0xff] }
 0x258   : > { %2572 = vmatpush3.msra.mxu1 %v3567_v63  ;;  %4294 = vst [vmem:[#allocation19_spill] sm:$0xff] %v3588_v54 }
 0x259   : > { %2929 = vpow2.f32 %v908_v55  ;;  %2573 = vmatprep.subr.mxu1 %v4264_v2  ;;  %v3595_v55 = vld [vmem:[%s4201_s7 + $0x38] sm:$0xff] }
 0x25a   : > { %2574 = vmatpush3.msra.mxu1 %v3574_v52  ;;  %4295 = vst [vmem:[#allocation20_spill] sm:$0xff] %v3595_v55 }
 0x25b   : > { %2575 = vmatprep.subr.mxu1 %v4264_v2 }
 0x25c   : > { %2576 = vmatpush3.msra.mxu1 %v3581_v53  ;;  %v3609_v53 = vld [vmem:[%s4201_s7 + $0x28] sm:$0xff] }
 0x25d   : > { %2577 = vmatprep.subr.mxu1 %v4264_v2  ;;  %4297 = vst [vmem:[#allocation22_spill] sm:$0xff] %v3609_v53 }
 0x25e   : > { %2578 = vmatpush3.msra.mxu1 %v3588_v54  ;;  %v3616_v54 = vld [vmem:[%s4201_s7 + $0x20] sm:$0xff] }
 0x25f   : > { %2579 = vmatprep.subr.mxu1 %v4264_v2  ;;  %4298 = vst [vmem:[#allocation23_spill] sm:$0xff] %v3616_v54 }
 0x260   : > { %2580 = vmatpush3.msra.mxu1 %v3595_v55  ;;  %v3623_v55 = vld [vmem:[%s4201_s7 + $0x18] sm:$0xff] }
 0x261   : > { %2581 = vmatprep.subr.mxu1 %v4264_v2  ;;  %4299 = vst [vmem:[#allocation24_spill] sm:$0xff] %v3623_v55 }
 0x266   : > { %v2930_v56 = vpop.eup %2929 }
 0x267   : > { %v910_v57 = vsel %vm903_vm1, %v2930_v56, 0.0 }
 0x268   : > { %911 = vadd.xlane.f32.xlu0 %v910_v57  ;;  %v3602_v57 = vld [vmem:[%s4201_s7 + $0x30] sm:$0xff] }
 0x269   : > { %4296 = vst [vmem:[#allocation21_spill] sm:$0xff] %v3602_v57  ;;  %2582 = vmatpush3.msra.mxu1 %v3602_v57  ;;  %v3630_v57 = vld [vmem:[%s4201_s7 + $0x10] sm:$0xff] }
 0x26a   : > { %2583 = vmatprep.subr.mxu1 %v4264_v2  ;;  %4300 = vst [vmem:[#allocation25_spill] sm:$0xff] %v3630_v57 }
 0x26b   : > { %2584 = vmatpush3.msra.mxu1 %v3609_v53  ;;  %v3637_v53 = vld [vmem:[%s4201_s7 + $0x8] sm:$0xff] }
 0x26c   : > { %2585 = vmatprep.subr.mxu1 %v4264_v2  ;;  %4301 = vst [vmem:[#allocation26_spill] sm:$0xff] %v3637_v53 }
 0x26d   : > { %2586 = vmatpush3.msra.mxu1 %v3616_v54 }
 0x26e   : > { %2587 = vmatprep.subr.mxu1 %v4264_v2 }
 0x26f   : > { %2588 = vmatpush3.msra.mxu1 %v3623_v55  ;;  %v3649_v55 = vld [vmem:[%s4201_s7] sm:$0xff] }
 0x270   : > { %2589 = vmatprep.subr.mxu1 %v4264_v2  ;;  %4302 = vst [vmem:[#allocation27_spill] sm:$0xff] %v3649_v55 }
 0x271   : > { %2590 = vmatpush3.msra.mxu1 %v3630_v57 }
 0x272   : > { %2591 = vmatprep.subr.mxu1 %v4264_v2 }
 0x273   : > { %2592 = vmatpush3.msra.mxu1 %v3637_v53 }
 0x274   : > { %2593 = vmatprep.subr.mxu1 %v4264_v2 }
 0x275   : > { %2594 = vmatpush3.msra.mxu1 %v3649_v55  ;;  %v544_v55 = vlaneseq }
 0x276   : > { %2633 = vmatprep.subr.mxu1 %v4264_v2 }
 0x277   : > { %v545_v61 = vand.u32 127, %v544_v55  ;;  %v3707_v55 = vld [vmem:[%s4203_s9 + $0x50] sm:$0xff] }
 0x278   : > { %4307 = vst [vmem:[#allocation32_spill] sm:$0xff] %v3707_v55 }
 0x279   : > { %vm546_vm2 = vcmp.lt.s32.totalorder %v545_v61, 32  ;;  %v3679_v61 = vld [vmem:[%s4203_s9 + $0x70] sm:$0xff] }
 0x27a   : > { %v3663_v60 = vsel %vm546_vm2, 1.0, %v4264_v2 }
 0x2f1   : > { %v912_v54 = vpop.xlane.xlu0 %911 }
 0x2f2   : > { %2931 = vrcp.f32 %v912_v54 }
 0x2ff   : > { %v2932_v52 = vpop.eup %2931 }
 0x300   : > { %v914_v63 = vmul.f32 %v2932_v52, %v2930_v56  ;;  %v3658_v56 = vld [vmem:[%s4202_s8] ss:$0 sm:$0xff] }
 0x301   : > { %4303 = vst [vmem:[#allocation28_spill] sm:$0xff] %v3658_v56 }
 0x302   : > { %2561 = vmatmul.mubr.msk.f32.vlgmr.msra.gmra.mxu0 %vm903_vm1, %v914_v63 }
 0x303   : > { %2630 = vmatprep.mubr.msk.f32.mxu0 %vm3016_vm0, %v4264_v2 }
 0x3c2   : > { %v984_v53 = vpop.f32.mrf.mxu0 }
 0x3c3   : > { %2596 = vmatmul.mubr.f32.vlgmr.msra.gmra.mxu1 %v984_v53 }
 0x3c4   : > { %v2562_v57 = vpop.f32.mrf.mxu0  ;;  %2665 = vmatprep.mubr.msk.f32.mxu1 %vm3016_vm0, %v4264_v2 }
 0x483   : > { %v1077_v63 = vpop.f32.mrf.mxu1 }
 0x484   : > { %v1078_v52 = vadd.f32 %v3658_v56, %v1077_v63  ;;  %v3714_v63 = vld [vmem:[%s4203_s9 + $0x48] sm:$0xff]  ;;  %v3747_v56 = vld [vmem:[%s4203_s9 + $0x20] sm:$0xff] }
 0x485   : > { %v2597_v54 = vpop.f32.mrf.mxu1  ;;  %4308 = vst [vmem:[#allocation33_spill] sm:$0xff] %v3714_v63  ;;  %4313 = vst [vmem:[#allocation38_spill] sm:$0xff] %v3747_v56 }
 0x486   : > { %v1081_v62 = vadd.f32 %v1078_v52, %v3383_v33  ;;  %v3672_v33 = vld [vmem:[%s4203_s9 + $0x78] sm:$0xff]  ;;  %v3721_v52 = vld [vmem:[%s4203_s9 + $0x40] sm:$0xff] }
 0x487   : > { %2599 = vmatpush3.msra.mxu0 %v3672_v33  ;;  %4309 = vst [vmem:[#allocation34_spill] sm:$0xff] %v3721_v52  ;;  %v3726_v54 = vld [vmem:[%s4203_s9 + $0x38] sm:$0xff] }
 0x488   : > { %1082 = vadd.xlane.f32.xlu1 %v1081_v62  ;;  %2600 = vmatprep.subr.mxu0 %v4264_v2  ;;  %4310 = vst [vmem:[#allocation35_spill] sm:$0xff] %v3726_v54 }
 0x489   : > { %2601 = vmatpush3.msra.mxu0 %v3679_v61 }
 0x48a   : > { %2602 = vmatprep.subr.mxu0 %v4264_v2 }
 0x511   : > { %v1083_v53 = vpop.xlane.xlu1 %1082 }
 0x512   : > { %v1084_v57 = vmul.f32 0.03125, %v1083_v53  ;;  %v3733_v53 = vld [vmem:[%s4203_s9 + $0x30] sm:$0xff] }
 0x513   : > { %4311 = vst [vmem:[#allocation36_spill] sm:$0xff] %v3733_v53 }
 0x514   : > { %v3665_v59 = vsub.f32 %v1081_v62, %v1084_v57  ;;  %v3700_v62 = vld [vmem:[%s4203_s9 + $0x58] sm:$0xff]  ;;  %v3740_v57 = vld [vmem:[%s4203_s9 + $0x28] sm:$0xff] }
 0x515   : > { %4306 = vst [vmem:[#allocation31_spill] sm:$0xff] %v3700_v62  ;;  %4312 = vst [vmem:[#allocation37_spill] sm:$0xff] %v3740_v57 }
 0x516   : > { %v1086_v58 = vmul.f32 %v3663_v60, %v3665_v59 }
 0x518   : > { %v1087_v51 = vmul.f32 %v1086_v58, %v1086_v58  ;;  %v3693_v58 = vld [vmem:[%s4203_s9 + $0x60] sm:$0xff] }
 0x519   : > { %4305 = vst [vmem:[#allocation30_spill] sm:$0xff] %v3693_v58 }
 0x51a   : > { %1088 = vadd.xlane.f32.xlu1 %v1087_v51  ;;  %v3686_v51 = vld [vmem:[%s4203_s9 + $0x68] sm:$0xff] }
 0x51b   : > { %4304 = vst [vmem:[#allocation29_spill] sm:$0xff] %v3686_v51  ;;  %2603 = vmatpush3.msra.mxu0 %v3686_v51 }
 0x51c   : > { %2604 = vmatprep.subr.mxu0 %v4264_v2 }
 0x51d   : > { %2605 = vmatpush3.msra.mxu0 %v3693_v58 }
 0x51e   : > { %2606 = vmatprep.subr.mxu0 %v4264_v2 }
 0x51f   : > { %2607 = vmatpush3.msra.mxu0 %v3700_v62 }
 0x520   : > { %2608 = vmatprep.subr.mxu0 %v4264_v2 }
 0x521   : > { %2609 = vmatpush3.msra.mxu0 %v3707_v55 }
 0x522   : > { %2610 = vmatprep.subr.mxu0 %v4264_v2 }
 0x523   : > { %2611 = vmatpush3.msra.mxu0 %v3714_v63 }
 0x524   : > { %2612 = vmatprep.subr.mxu0 %v4264_v2 }
 0x525   : > { %2613 = vmatpush3.msra.mxu0 %v3721_v52 }
 0x526   : > { %2614 = vmatprep.subr.mxu0 %v4264_v2 }
 0x527   : > { %2615 = vmatpush3.msra.mxu0 %v3726_v54 }
 0x528   : > { %2616 = vmatprep.subr.mxu0 %v4264_v2 }
 0x529   : > { %2617 = vmatpush3.msra.mxu0 %v3733_v53  ;;  %v3761_v53 = vld [vmem:[%s4203_s9 + $0x10] sm:$0xff] }
 0x52a   : > { %2618 = vmatprep.subr.mxu0 %v4264_v2  ;;  %4315 = vst [vmem:[#allocation40_spill] sm:$0xff] %v3761_v53 }
 0x52b   : > { %2619 = vmatpush3.msra.mxu0 %v3740_v57  ;;  %v3768_v57 = vld [vmem:[%s4203_s9 + $0x8] sm:$0xff] }
 0x52c   : > { %2620 = vmatprep.subr.mxu0 %v4264_v2  ;;  %4316 = vst [vmem:[#allocation41_spill] sm:$0xff] %v3768_v57 }
 0x52d   : > { %2621 = vmatpush3.msra.mxu0 %v3747_v56  ;;  %v3775_v56 = vld [vmem:[%s4203_s9] sm:$0xff] }
 0x52e   : > { %2622 = vmatprep.subr.mxu0 %v4264_v2  ;;  %4317 = vst [vmem:[#allocation42_spill] sm:$0xff] %v3775_v56 }
 0x52f   : > { %2623 = vmatpush3.msra.mxu0 %v3754_v50  ;;  %v3783_v50 = vld [vmem:[%s4205_s11 + $0x78] sm:$0xff] }
 0x530   : > { %2624 = vmatprep.subr.mxu0 %v4264_v2  ;;  %4318 = vst [vmem:[#allocation43_spill] sm:$0xff] %v3783_v50  ;;  %2634 = vmatpush3.msra.mxu1 %v3783_v50  ;;  %v3810_v50 = vld [vmem:[%s4205_s11 + $0x58] sm:$0xff] }
 0x531   : > { %2625 = vmatpush3.msra.mxu0 %v3761_v53  ;;  %v3788_v53 = vld [vmem:[%s4205_s11 + $0x70] sm:$0xff]  ;;  %2635 = vmatprep.subr.mxu1 %v4264_v2  ;;  %4322 = vst [vmem:[#allocation47_spill] sm:$0xff] %v3810_v50 }
 0x532   : > { %2626 = vmatprep.subr.mxu0 %v4264_v2  ;;  %4319 = vst [vmem:[#allocation44_spill] sm:$0xff] %v3788_v53  ;;  %2636 = vmatpush3.msra.mxu1 %v3788_v53  ;;  %v3817_v53 = vld [vmem:[%s4205_s11 + $0x50] sm:$0xff] }
 0x533   : > { %2627 = vmatpush3.msra.mxu0 %v3768_v57  ;;  %2637 = vmatprep.subr.mxu1 %v4264_v2  ;;  %v3803_v57 = vld [vmem:[%s4205_s11 + $0x60] sm:$0xff]  ;;  %4323 = vst [vmem:[#allocation48_spill] sm:$0xff] %v3817_v53 }
 0x534   : > { %2628 = vmatprep.subr.mxu0 %v4264_v2  ;;  %4321 = vst [vmem:[#allocation46_spill] sm:$0xff] %v3803_v57 }
 0x535   : > { %2629 = vmatpush3.msra.mxu0 %v3775_v56  ;;  %v3796_v56 = vld [vmem:[%s4205_s11 + $0x68] sm:$0xff] }
 0x536   : > { %2668 = vmatprep.subr.mxu0 %v4264_v2  ;;  %4320 = vst [vmem:[#allocation45_spill] sm:$0xff] %v3796_v56  ;;  %2638 = vmatpush3.msra.mxu1 %v3796_v56  ;;  %v3824_v56 = vld [vmem:[%s4205_s11 + $0x48] sm:$0xff] }
 0x537   : > { %2639 = vmatprep.subr.mxu1 %v4264_v2  ;;  %4324 = vst [vmem:[#allocation49_spill] sm:$0xff] %v3824_v56 }
 0x538   : > { %2640 = vmatpush3.msra.mxu1 %v3803_v57  ;;  %v3831_v57 = vld [vmem:[%s4205_s11 + $0x40] sm:$0xff] }
 0x539   : > { %2641 = vmatprep.subr.mxu1 %v4264_v2  ;;  %4325 = vst [vmem:[#allocation50_spill] sm:$0xff] %v3831_v57 }
 0x53a   : > { %2642 = vmatpush3.msra.mxu1 %v3810_v50  ;;  %v3838_v50 = vld [vmem:[%s4205_s11 + $0x38] sm:$0xff] }
 0x53b   : > { %2643 = vmatprep.subr.mxu1 %v4264_v2  ;;  %4326 = vst [vmem:[#allocation51_spill] sm:$0xff] %v3838_v50 }
 0x53c   : > { %2644 = vmatpush3.msra.mxu1 %v3817_v53  ;;  %v3845_v53 = vld [vmem:[%s4205_s11 + $0x30] sm:$0xff] }
 0x53d   : > { %2645 = vmatprep.subr.mxu1 %v4264_v2  ;;  %4327 = vst [vmem:[#allocation52_spill] sm:$0xff] %v3845_v53 }
 0x53e   : > { %2646 = vmatpush3.msra.mxu1 %v3824_v56  ;;  %v3852_v56 = vld [vmem:[%s4205_s11 + $0x28] sm:$0xff] }
 0x53f   : > { %2647 = vmatprep.subr.mxu1 %v4264_v2  ;;  %4328 = vst [vmem:[#allocation53_spill] sm:$0xff] %v3852_v56 }
 0x540   : > { %2648 = vmatpush3.msra.mxu1 %v3831_v57  ;;  %v3859_v57 = vld [vmem:[%s4205_s11 + $0x20] sm:$0xff] }
 0x541   : > { %2649 = vmatprep.subr.mxu1 %v4264_v2  ;;  %4329 = vst [vmem:[#allocation54_spill] sm:$0xff] %v3859_v57 }
 0x542   : > { %2650 = vmatpush3.msra.mxu1 %v3838_v50  ;;  %v3866_v50 = vld [vmem:[%s4205_s11 + $0x18] sm:$0xff] }
 0x543   : > { %2651 = vmatprep.subr.mxu1 %v4264_v2  ;;  %4330 = vst [vmem:[#allocation55_spill] sm:$0xff] %v3866_v50 }
 0x544   : > { %2652 = vmatpush3.msra.mxu1 %v3845_v53 }
 0x545   : > { %2653 = vmatprep.subr.mxu1 %v4264_v2 }
 0x546   : > { %2654 = vmatpush3.msra.mxu1 %v3852_v56 }
 0x547   : > { %2655 = vmatprep.subr.mxu1 %v4264_v2 }
 0x548   : > { %2656 = vmatpush3.msra.mxu1 %v3859_v57  ;;  %v2211_v57 = vld [vmem:[%s4207_s13] ss:$0 sm:$0xff] }
 0x549   : > { %2657 = vmatprep.subr.mxu1 %v4264_v2 }
 0x54a   : > { %2658 = vmatpush3.msra.mxu1 %v3866_v50  ;;  %v1106_v50 = vmul.f32 %v2211_v57, %v3665_v59 }
 0x54b   : > { %2659 = vmatprep.subr.mxu1 %v4264_v2 }
 0x5a3   : > { %v1089_v53 = vpop.xlane.xlu1 %1088 }
 0x5a4   : > { %v1090_v54 = vmul.f32 0.032258064, %v1089_v53  ;;  %v2212_v53 = vld [vmem:[%s4208_s14] ss:$0 sm:$0xff] }
 0x5a6   : > { %2933 = vrsqrt.f32 %v1090_v54  ;;  %vm1093_vm3 = vcmp.eq.f32.partialorder %v1090_v54, inf  ;;  %v1096_v63 = vand.u32 2147483648, %v1090_v54  ;;  %vm1095_vm4 = vcmp.eq.f32.partialorder %v1090_v54, 0.0 }
 0x5b3   : > { %v2934_v52 = vpop.eup %2933 }
 0x5b4   : > { %v1092_v56 = vmul.f32 %v2934_v52, %v1090_v54 }
 0x5b6   : > { %v1094_v55 = vsel %vm1093_vm3, %v1090_v54, %v1092_v56  ;;  %v4331_v56 = vmov 0.0  }
 0x5b7   : > { %v1097_v62 = vsel %vm1095_vm4, %v1096_v63, %v1094_v55 }
 0x5b8   : > { %v1098_v58 = vadd.f32 1e-06, %v1097_v62  ;;  %v4348_v62 = vld [vmem:[#allocation11_spill] sm:$0xff] }
 0x5ba   : > { %2935 = vrcp.f32 %v1098_v58 }
 0x5c7   : > { %v2936_v51 = vpop.eup %2935 }
 0x5c8   : > { %v1107_v2 = vmul.f32 %v2936_v51, %v1106_v50 }
 0x5ca   : > { %v3879_v52 = vadd.f32 %v2212_v53, %v1107_v2  ;;  %v3926_v2 = vld [vmem:[%s4205_s11 + $0x8] sm:$0xff] }
 0x5cc   : > { %2631 = vmatmul.mubr.f32.vlgmr.msra.gmra.mxu0 %v3879_v52 }
 0x5cd   : > { %2669 = vmatpush3.msra.mxu0 %v3164_v1  ;;  %2700 = vmatprep.mubr.msk.f32.mxu0 %vm3016_vm0, %v4331_v56  ;;  %v3919_v1 = vld [vmem:[%s4205_s11 + $0x10] sm:$0xff] }
 0x5ce   : > { %2670 = vmatprep.subr.mxu0 %v4331_v56  ;;  %2660 = vmatpush3.msra.mxu1 %v3919_v1 }
 0x5cf   : > { %2671 = vmatpush3.msra.mxu0 %v3176_v4  ;;  %2661 = vmatprep.subr.mxu1 %v4331_v56  ;;  %v3933_v4 = vld [vmem:[%s4205_s11] sm:$0xff] }
 0x5d0   : > { %2672 = vmatprep.subr.mxu0 %v4331_v56  ;;  %2662 = vmatpush3.msra.mxu1 %v3926_v2 }
 0x5d1   : > { %2673 = vmatpush3.msra.mxu0 %v3190_v6  ;;  %2663 = vmatprep.subr.mxu1 %v4331_v56  ;;  %v3940_v6 = vld [vmem:[%s4204_s10] ss:$0 sm:$0xff] }
 0x5d2   : > { %2674 = vmatprep.subr.mxu0 %v4331_v56  ;;  %2664 = vmatpush3.msra.mxu1 %v3933_v4 }
 0x5d3   : > { %2675 = vmatpush3.msra.mxu0 %v3204_v8  ;;  %2703 = vmatprep.subr.mxu1 %v4331_v56 }
 0x5d4   : > { %2676 = vmatprep.subr.mxu0 %v4331_v56 }
 0x5d5   : > { %2677 = vmatpush3.msra.mxu0 %v3218_v10 }
 0x5d6   : > { %2678 = vmatprep.subr.mxu0 %v4331_v56 }
 0x5d7   : > { %2679 = vmatpush3.msra.mxu0 %v3232_v12 }
 0x5d8   : > { %2680 = vmatprep.subr.mxu0 %v4331_v56 }
 0x5d9   : > { %2681 = vmatpush3.msra.mxu0 %v3246_v14 }
 0x5da   : > { %2682 = vmatprep.subr.mxu0 %v4331_v56 }
 0x5db   : > { %2683 = vmatpush3.msra.mxu0 %v3260_v16 }
 0x5dc   : > { %2684 = vmatprep.subr.mxu0 %v4331_v56 }
 0x5dd   : > { %2685 = vmatpush3.msra.mxu0 %v3274_v18 }
 0x5de   : > { %2686 = vmatprep.subr.mxu0 %v4331_v56 }
 0x5df   : > { %2687 = vmatpush3.msra.mxu0 %v3288_v20 }
 0x5e0   : > { %2688 = vmatprep.subr.mxu0 %v4331_v56 }
 0x5e1   : > { %2689 = vmatpush3.msra.mxu0 %v3303_v22 }
 0x5e2   : > { %2690 = vmatprep.subr.mxu0 %v4331_v56 }
 0x5e3   : > { %2691 = vmatpush3.msra.mxu0 %v3317_v24 }
 0x5e4   : > { %2692 = vmatprep.subr.mxu0 %v4331_v56 }
 0x5e5   : > { %2693 = vmatpush3.msra.mxu0 %v3332_v26  ;;  %v2215_v26 = vld [vmem:[%s4209_s15] ss:$0 sm:$0xff] }
 0x5e6   : > { %2694 = vmatprep.subr.mxu0 %v4331_v56 }
 0x5e7   : > { %2695 = vmatpush3.msra.mxu0 %v3346_v28 }
 0x5e8   : > { %2696 = vmatprep.subr.mxu0 %v4331_v56 }
 0x5e9   : > { %2697 = vmatpush3.msra.mxu0 %v3360_v30 }
 0x5ea   : > { %2698 = vmatprep.subr.mxu0 %v4331_v56 }
 0x5eb   : > { %2699 = vmatpush3.msra.mxu0 %v3379_v32  ;;  %v4332_v32 = vld [vmem:[#allocation29_spill] sm:$0xff] }
 0x5ec   : > { %2738 = vmatprep.subr.mxu0 %v4331_v56 }
 0x68c   : > { %v1204_v8 = vpop.f32.mrf.mxu0 }
 0x68d   : > { %v1205_v10 = vadd.f32 %v3940_v6, %v1204_v8 }
 0x68e   : > { %v2632_v12 = vpop.f32.mrf.mxu0 }
 0x68f   : > { %v1208_v14 = vmax.f32 %v1205_v10, 0.0 }
 0x691   : > { %2666 = vmatmul.mubr.f32.vlgmr.msra.gmra.mxu1 %v1208_v14 }
 0x692   : > { %2704 = vmatpush3.msra.mxu1 %v3159_v0  ;;  %2735 = vmatprep.mubr.msk.f32.mxu1 %vm3016_vm0, %v4331_v56  ;;  %v3980_v0 = vld [vmem:[%s4206_s12] ss:$0 sm:$0xff] }
 0x693   : > { %2705 = vmatprep.subr.mxu1 %v4331_v56 }
 0x694   : > { %2706 = vmatpush3.msra.mxu1 %v3171_v3 }
 0x695   : > { %2707 = vmatprep.subr.mxu1 %v4331_v56 }
 0x696   : > { %2708 = vmatpush3.msra.mxu1 %v3185_v5 }
 0x697   : > { %2709 = vmatprep.subr.mxu1 %v4331_v56 }
 0x698   : > { %2710 = vmatpush3.msra.mxu1 %v3199_v7 }
 0x699   : > { %2711 = vmatprep.subr.mxu1 %v4331_v56 }
 0x69a   : > { %2712 = vmatpush3.msra.mxu1 %v3213_v9 }
 0x69b   : > { %2713 = vmatprep.subr.mxu1 %v4331_v56 }
 0x69c   : > { %2714 = vmatpush3.msra.mxu1 %v3227_v11 }
 0x69d   : > { %2715 = vmatprep.subr.mxu1 %v4331_v56 }
 0x69e   : > { %2716 = vmatpush3.msra.mxu1 %v3241_v13 }
 0x69f   : > { %2717 = vmatprep.subr.mxu1 %v4331_v56 }
 0x6a0   : > { %2718 = vmatpush3.msra.mxu1 %v3255_v15 }
 0x6a1   : > { %2719 = vmatprep.subr.mxu1 %v4331_v56 }
 0x6a2   : > { %2720 = vmatpush3.msra.mxu1 %v3269_v17 }
 0x6a3   : > { %2721 = vmatprep.subr.mxu1 %v4331_v56 }
 0x6a4   : > { %2722 = vmatpush3.msra.mxu1 %v3283_v19 }
 0x6a5   : > { %2723 = vmatprep.subr.mxu1 %v4331_v56 }
 0x6a6   : > { %2724 = vmatpush3.msra.mxu1 %v3298_v21 }
 0x6a7   : > { %2725 = vmatprep.subr.mxu1 %v4331_v56 }
 0x6a8   : > { %2726 = vmatpush3.msra.mxu1 %v3312_v23 }
 0x6a9   : > { %2727 = vmatprep.subr.mxu1 %v4331_v56 }
 0x6aa   : > { %2728 = vmatpush3.msra.mxu1 %v3327_v25 }
 0x6ab   : > { %2729 = vmatprep.subr.mxu1 %v4331_v56 }
 0x6ac   : > { %2730 = vmatpush3.msra.mxu1 %v3341_v27 }
 0x6ad   : > { %2731 = vmatprep.subr.mxu1 %v4331_v56 }
 0x6ae   : > { %2732 = vmatpush3.msra.mxu1 %v3355_v29  ;;  %v2216_v29 = vld [vmem:[%s4210_s16] ss:$0 sm:$0xff] }
 0x6af   : > { %2733 = vmatprep.subr.mxu1 %v4331_v56 }
 0x6b0   : > { %2734 = vmatpush3.msra.mxu1 %v3372_v31 }
 0x6b1   : > { %2773 = vmatprep.subr.mxu1 %v4331_v56 }
 0x751   : > { %v1298_v3 = vpop.f32.mrf.mxu1 }
 0x752   : > { %v1299_v5 = vadd.f32 %v3980_v0, %v1298_v3 }
 0x753   : > { %v2667_v7 = vpop.f32.mrf.mxu1 }
 0x754   : > { %v1302_v9 = vadd.f32 %v1299_v5, %v3879_v52 }
 0x756   : > { %1303 = vadd.xlane.f32.xlu0 %v1302_v9 }
 0x7df   : > { %v1304_v11 = vpop.xlane.xlu0 %1303 }
 0x7e0   : > { %v1305_v13 = vmul.f32 0.03125, %v1304_v11  ;;  %v4350_v11 = vld [vmem:[#allocation13_spill] sm:$0xff] }
 0x7e2   : > { %v1306_v15 = vsub.f32 %v1302_v9, %v1305_v13  ;;  %v4349_v9 = vld [vmem:[#allocation12_spill] sm:$0xff]  ;;  %v4351_v13 = vld [vmem:[#allocation14_spill] sm:$0xff] }
 0x7e4   : > { %v1307_v16 = vmul.f32 %v3663_v60, %v1306_v15  ;;  %v1327_v27 = vmul.f32 %v2215_v26, %v1306_v15  ;;  %v4352_v15 = vld [vmem:[#allocation15_spill] sm:$0xff]  ;;  %v4363_v26 = vld [vmem:[#allocation26_spill] sm:$0xff] }
 0x7e6   : > { %v1308_v17 = vmul.f32 %v1307_v16, %v1307_v16  ;;  %v4353_v16 = vld [vmem:[#allocation16_spill] sm:$0xff] }
 0x7e8   : > { %1309 = vadd.xlane.f32.xlu1 %v1308_v17  ;;  %v4354_v17 = vld [vmem:[#allocation17_spill] sm:$0xff] }
 0x871   : > { %v1310_v18 = vpop.xlane.xlu1 %1309 }
 0x872   : > { %v1311_v19 = vmul.f32 0.032258064, %v1310_v18  ;;  %v4355_v18 = vld [vmem:[#allocation18_spill] sm:$0xff] }
 0x874   : > { %2937 = vrsqrt.f32 %v1311_v19  ;;  %vm1314_vm5 = vcmp.eq.f32.partialorder %v1311_v19, inf  ;;  %v1317_v22 = vand.u32 2147483648, %v1311_v19  ;;  %vm1316_vm6 = vcmp.eq.f32.partialorder %v1311_v19, 0.0 }
 0x881   : > { %v2938_v20 = vpop.eup %2937 }
 0x882   : > { %v1313_v21 = vmul.f32 %v2938_v20, %v1311_v19  ;;  %v4357_v20 = vld [vmem:[#allocation20_spill] sm:$0xff] }
 0x884   : > { %v1315_v23 = vsel %vm1314_vm5, %v1311_v19, %v1313_v21  ;;  %v4356_v19 = vld [vmem:[#allocation19_spill] sm:$0xff]  ;;  %v4358_v21 = vld [vmem:[#allocation21_spill] sm:$0xff] }
 0x885   : > { %v1318_v24 = vsel %vm1316_vm6, %v1317_v22, %v1315_v23  ;;  %v4359_v22 = vld [vmem:[#allocation22_spill] sm:$0xff]  ;;  %v4360_v23 = vld [vmem:[#allocation23_spill] sm:$0xff] }
 0x886   : > { %v1319_v25 = vadd.f32 1e-06, %v1318_v24  ;;  %v4361_v24 = vld [vmem:[#allocation24_spill] sm:$0xff] }
 0x888   : > { %2939 = vrcp.f32 %v1319_v25  ;;  %v4362_v25 = vld [vmem:[#allocation25_spill] sm:$0xff] }
 0x895   : > { %v2940_v28 = vpop.eup %2939 }
 0x896   : > { %v1328_v30 = vmul.f32 %v2940_v28, %v1327_v27  ;;  %v4364_v27 = vld [vmem:[#allocation27_spill] sm:$0xff] }
 0x898   : > { %v3991_v31 = vadd.f32 %v2216_v29, %v1328_v30  ;;  %v4365_v30 = vld [vmem:[#allocation43_spill] sm:$0xff] }
 0x89a   : > { %2701 = vmatmul.mubr.f32.vlgmr.msra.gmra.mxu0 %v3991_v31  ;;  %2736 = vmatmul.mubr.f32.vlgmr.msra.gmra.mxu1 %v3991_v31 }
 0x89b   : > { %2739 = vmatpush3.msra.mxu0 %v3394_v34  ;;  %2770 = vmatprep.mubr.msk.f32.mxu0 %vm3016_vm0, %v4331_v56  ;;  %v4333_v34 = vld [vmem:[#allocation30_spill] sm:$0xff] }
 0x89c   : > { %2740 = vmatprep.subr.mxu0 %v4331_v56  ;;  %2775 = vmatprep.mubr.msk.f32.mxu1 %vm3016_vm0, %v4331_v56 }
 0x89d   : > { %2741 = vmatpush3.msra.mxu0 %v3402_v35  ;;  %v4334_v35 = vld [vmem:[#allocation31_spill] sm:$0xff] }
 0x89e   : > { %2742 = vmatprep.subr.mxu0 %v4331_v56 }
 0x89f   : > { %2743 = vmatpush3.msra.mxu0 %v3412_v36  ;;  %v4335_v36 = vld [vmem:[#allocation32_spill] sm:$0xff] }
 0x8a0   : > { %2744 = vmatprep.subr.mxu0 %v4331_v56 }
 0x8a1   : > { %2745 = vmatpush3.msra.mxu0 %v3421_v37  ;;  %v4336_v37 = vld [vmem:[#allocation33_spill] sm:$0xff] }
 0x8a2   : > { %2746 = vmatprep.subr.mxu0 %v4331_v56 }
 0x8a3   : > { %2747 = vmatpush3.msra.mxu0 %v3428_v38  ;;  %v4337_v38 = vld [vmem:[#allocation34_spill] sm:$0xff] }
 0x8a4   : > { %2748 = vmatprep.subr.mxu0 %v4331_v56 }
 0x8a5   : > { %2749 = vmatpush3.msra.mxu0 %v3435_v39  ;;  %v4338_v39 = vld [vmem:[#allocation35_spill] sm:$0xff] }
 0x8a6   : > { %2750 = vmatprep.subr.mxu0 %v4331_v56 }
 0x8a7   : > { %2751 = vmatpush3.msra.mxu0 %v3442_v40  ;;  %v4339_v40 = vld [vmem:[#allocation36_spill] sm:$0xff] }
 0x8a8   : > { %2752 = vmatprep.subr.mxu0 %v4331_v56 }
 0x8a9   : > { %2753 = vmatpush3.msra.mxu0 %v3449_v41  ;;  %v4340_v41 = vld [vmem:[#allocation37_spill] sm:$0xff] }
 0x8aa   : > { %2754 = vmatprep.subr.mxu0 %v4331_v56 }
 0x8ab   : > { %2755 = vmatpush3.msra.mxu0 %v3456_v42  ;;  %v4341_v42 = vld [vmem:[#allocation38_spill] sm:$0xff] }
 0x8ac   : > { %2756 = vmatprep.subr.mxu0 %v4331_v56 }
 0x8ad   : > { %2757 = vmatpush3.msra.mxu0 %v3463_v43  ;;  %v4342_v43 = vld [vmem:[#allocation39_spill] sm:$0xff] }
 0x8ae   : > { %2758 = vmatprep.subr.mxu0 %v4331_v56 }
 0x8af   : > { %2759 = vmatpush3.msra.mxu0 %v3470_v44  ;;  %v4343_v44 = vld [vmem:[#allocation40_spill] sm:$0xff] }
 0x8b0   : > { %2760 = vmatprep.subr.mxu0 %v4331_v56 }
 0x8b1   : > { %2761 = vmatpush3.msra.mxu0 %v3477_v45  ;;  %v4344_v45 = vld [vmem:[#allocation41_spill] sm:$0xff] }
 0x8b2   : > { %2762 = vmatprep.subr.mxu0 %v4331_v56 }
 0x8b3   : > { %2763 = vmatpush3.msra.mxu0 %v3484_v46  ;;  %v4345_v46 = vld [vmem:[#allocation42_spill] sm:$0xff] }
 0x8b4   : > { %2764 = vmatprep.subr.mxu0 %v4331_v56 }
 0x8b5   : > { %2765 = vmatpush3.msra.mxu0 %v3491_v47 }
 0x8b6   : > { %2766 = vmatprep.subr.mxu0 %v4331_v56 }
 0x8b7   : > { %2767 = vmatpush3.msra.mxu0 %v3498_v48 }
 0x8b8   : > { %2768 = vmatprep.subr.mxu0 %v4331_v56 }
 0x8b9   : > { %2769 = vmatpush3.msra.mxu0 %v3505_v49  ;;  %v4346_v49 = vld [vmem:[#allocation9_spill] sm:$0xff] }
 0x8ba   : > { %2771 = vmatmul.mubr.f32.vlgmr.msra.gmra.mxu0 %v3991_v31  ;;  %2818 = vmatprep.subr.mxu0 %v4331_v56 }
 0x8bb   : > { %2819 = vmatpush3.msra.mxu0 %v3672_v33  ;;  %2850 = vmatprep.mubr.msk.f32.mxu0 %vm3016_vm0, %v4331_v56 }
 0x8bc   : > { %2820 = vmatprep.subr.mxu0 %v4331_v56 }
 0x8bd   : > { %2821 = vmatpush3.msra.mxu0 %v3679_v61  ;;  %v4347_v61 = vld [vmem:[#allocation10_spill] sm:$0xff] }
 0x8be   : > { %2822 = vmatprep.subr.mxu0 %v4331_v56 }
 0x8bf   : > { %2823 = vmatpush3.msra.mxu0 %v4332_v32  ;;  %v4366_v32 = vld [vmem:[#allocation44_spill] sm:$0xff] }
 0x8c0   : > { %2824 = vmatprep.subr.mxu0 %v4331_v56 }
 0x8c1   : > { %2825 = vmatpush3.msra.mxu0 %v4333_v34  ;;  %v4367_v34 = vld [vmem:[#allocation45_spill] sm:$0xff] }
 0x8c2   : > { %2826 = vmatprep.subr.mxu0 %v4331_v56 }
 0x8c3   : > { %2827 = vmatpush3.msra.mxu0 %v4334_v35  ;;  %v4368_v35 = vld [vmem:[#allocation46_spill] sm:$0xff] }
 0x8c4   : > { %2828 = vmatprep.subr.mxu0 %v4331_v56 }
 0x8c5   : > { %2829 = vmatpush3.msra.mxu0 %v4335_v36  ;;  %v4369_v36 = vld [vmem:[#allocation47_spill] sm:$0xff] }
 0x8c6   : > { %2830 = vmatprep.subr.mxu0 %v4331_v56 }
 0x8c7   : > { %2831 = vmatpush3.msra.mxu0 %v4336_v37  ;;  %v4370_v37 = vld [vmem:[#allocation48_spill] sm:$0xff] }
 0x8c8   : > { %2832 = vmatprep.subr.mxu0 %v4331_v56 }
 0x8c9   : > { %2833 = vmatpush3.msra.mxu0 %v4337_v38  ;;  %v4371_v38 = vld [vmem:[#allocation49_spill] sm:$0xff] }
 0x8ca   : > { %2834 = vmatprep.subr.mxu0 %v4331_v56 }
 0x8cb   : > { %2835 = vmatpush3.msra.mxu0 %v4338_v39  ;;  %v4372_v39 = vld [vmem:[#allocation50_spill] sm:$0xff] }
 0x8cc   : > { %2836 = vmatprep.subr.mxu0 %v4331_v56 }
 0x8cd   : > { %2837 = vmatpush3.msra.mxu0 %v4339_v40  ;;  %v4373_v40 = vld [vmem:[#allocation51_spill] sm:$0xff] }
 0x8ce   : > { %2838 = vmatprep.subr.mxu0 %v4331_v56 }
 0x8cf   : > { %2839 = vmatpush3.msra.mxu0 %v4340_v41  ;;  %v4374_v41 = vld [vmem:[#allocation52_spill] sm:$0xff] }
 0x8d0   : > { %2840 = vmatprep.subr.mxu0 %v4331_v56 }
 0x8d1   : > { %2841 = vmatpush3.msra.mxu0 %v4341_v42  ;;  %v4375_v42 = vld [vmem:[#allocation53_spill] sm:$0xff] }
 0x8d2   : > { %2842 = vmatprep.subr.mxu0 %v4331_v56 }
 0x8d3   : > { %2843 = vmatpush3.msra.mxu0 %v4342_v43  ;;  %v4376_v43 = vld [vmem:[#allocation54_spill] sm:$0xff] }
 0x8d4   : > { %2844 = vmatprep.subr.mxu0 %v4331_v56 }
 0x8d5   : > { %2845 = vmatpush3.msra.mxu0 %v4343_v44  ;;  %v4377_v44 = vld [vmem:[#allocation55_spill] sm:$0xff] }
 0x8d6   : > { %2846 = vmatprep.subr.mxu0 %v4331_v56 }
 0x8d7   : > { %2847 = vmatpush3.msra.mxu0 %v4344_v45 }
 0x8d8   : > { %2848 = vmatprep.subr.mxu0 %v4331_v56 }
 0x8d9   : > { %2849 = vmatpush3.msra.mxu0 %v4345_v46  ;;  %v4378_v46 = vld [vmem:[#allocation28_spill] sm:$0xff] }
 0x95a   : > { %v1433_v47 = vpop.f32.mrf.mxu0  ;;  %v1526_v48 = vpop.f32.mrf.mxu1 }
 0x95b   : > { %v1527_v50 = vadd.f32 %v4346_v49, %v1526_v48  ;;  %v1434_v51 = vadd.f32 %v4347_v61, %v1433_v47 }
 0x95c   : > { %v2702_v59 = vpop.f32.mrf.mxu0  ;;  %v2737_v33 = vpop.f32.mrf.mxu1 }
 0x95d   : > { %2774 = vmatpush3.xpose.msra.mxu1 %v1527_v50 }
 0x95e   : > { %2778 = vmatprep.subr.mxu1 %v4331_v56 }
 0x960   : > { %2776 = vmatmul.mubr.f32.vlgmr.msra.gmra.mxu1 %v1434_v51 }
 0x961   : > { %2780 = vmatprep.mubr.msk.f32.mxu1 %vm3016_vm0, %v4331_v56 }
 0x97a   : > { %v1619_v58 = vpop.f32.mrf.mxu0 }
 0x97b   : > { %v1620_v55 = vadd.f32 %v4348_v62, %v1619_v58 }
 0x97c   : > { %v2772_v63 = vpop.f32.mrf.mxu0 }
 0x97d   : > { %2779 = vmatpush3.msra.mxu1 %v1620_v55 }
 0x97e   : > { %2783 = vmatprep.subr.mxu1 %v4331_v56 }
 0xa20   : > { %v1689_v54 = vpop.f32.mrf.mxu1 }
 0xa21   : > { %v1693_v57 = vsel %vm903_vm1, %v1689_v54, -inf }
 0xa22   : > { %1694 = vmax.xlane.f32.xlu0 %v1693_v57  ;;  %v2777_v53 = vpop.f32.mrf.mxu1 }
 0xa23   : > { %v2227_v53 = vld [vmem:[%s4208_s14 + $0x1] ss:$0 sm:$0xff] }
 0xaab   : > { %v1695_v52 = vpop.xlane.xlu0 %1694 }
 0xaac   : > { %v1696_v8 = vsub.f32 %v1689_v54, %v1695_v52 }
 0xaae   : > { %v1697_v10 = vmul.f32 1.442695, %v1696_v8 }
 0xab0   : > { %2941 = vpow2.f32 %v1697_v10 }
 0xabd   : > { %v2942_v12 = vpop.eup %2941 }
 0xabe   : > { %v1699_v14 = vsel %vm903_vm1, %v2942_v12, 0.0 }
 0xabf   : > { %1700 = vadd.xlane.f32.xlu1 %v1699_v14 }
 0xb48   : > { %v1701_v3 = vpop.xlane.xlu1 %1700 }
 0xb49   : > { %2943 = vrcp.f32 %v1701_v3 }
 0xb56   : > { %v2944_v5 = vpop.eup %2943 }
 0xb57   : > { %v1703_v7 = vmul.f32 %v2944_v5, %v2942_v12 }
 0xb59   : > { %2781 = vmatmul.mubr.msk.f32.vlgmr.msra.gmra.mxu1 %vm903_vm1, %v1703_v7 }
 0xb5a   : > { %2784 = vmatpush3.msra.mxu1 %v4349_v9  ;;  %2815 = vmatprep.mubr.msk.f32.mxu1 %vm3016_vm0, %v4331_v56 }
 0xb5b   : > { %2785 = vmatprep.subr.mxu1 %v4331_v56 }
 0xb5c   : > { %2786 = vmatpush3.msra.mxu1 %v4350_v11 }
 0xb5d   : > { %2787 = vmatprep.subr.mxu1 %v4331_v56 }
 0xb5e   : > { %2788 = vmatpush3.msra.mxu1 %v4351_v13 }
 0xb5f   : > { %2789 = vmatprep.subr.mxu1 %v4331_v56 }
 0xb60   : > { %2790 = vmatpush3.msra.mxu1 %v4352_v15 }
 0xb61   : > { %2791 = vmatprep.subr.mxu1 %v4331_v56 }
 0xb62   : > { %2792 = vmatpush3.msra.mxu1 %v4353_v16 }
 0xb63   : > { %2793 = vmatprep.subr.mxu1 %v4331_v56 }
 0xb64   : > { %2794 = vmatpush3.msra.mxu1 %v4354_v17 }
 0xb65   : > { %2795 = vmatprep.subr.mxu1 %v4331_v56 }
 0xb66   : > { %2796 = vmatpush3.msra.mxu1 %v4355_v18 }
 0xb67   : > { %2797 = vmatprep.subr.mxu1 %v4331_v56 }
 0xb68   : > { %2798 = vmatpush3.msra.mxu1 %v4356_v19 }
 0xb69   : > { %2799 = vmatprep.subr.mxu1 %v4331_v56 }
 0xb6a   : > { %2800 = vmatpush3.msra.mxu1 %v4357_v20 }
 0xb6b   : > { %2801 = vmatprep.subr.mxu1 %v4331_v56 }
 0xb6c   : > { %2802 = vmatpush3.msra.mxu1 %v4358_v21 }
 0xb6d   : > { %2803 = vmatprep.subr.mxu1 %v4331_v56 }
 0xb6e   : > { %2804 = vmatpush3.msra.mxu1 %v4359_v22 }
 0xb6f   : > { %2805 = vmatprep.subr.mxu1 %v4331_v56 }
 0xb70   : > { %2806 = vmatpush3.msra.mxu1 %v4360_v23 }
 0xb71   : > { %2807 = vmatprep.subr.mxu1 %v4331_v56 }
 0xb72   : > { %2808 = vmatpush3.msra.mxu1 %v4361_v24 }
 0xb73   : > { %2809 = vmatprep.subr.mxu1 %v4331_v56 }
 0xb74   : > { %2810 = vmatpush3.msra.mxu1 %v4362_v25 }
 0xb75   : > { %2811 = vmatprep.subr.mxu1 %v4331_v56 }
 0xb76   : > { %2812 = vmatpush3.msra.mxu1 %v4363_v26 }
 0xb77   : > { %2813 = vmatprep.subr.mxu1 %v4331_v56 }
 0xb78   : > { %2814 = vmatpush3.msra.mxu1 %v4364_v27  ;;  %v2231_v27 = vld [vmem:[%s4210_s16 + $0x1] ss:$0 sm:$0xff] }
 0xb79   : > { %2853 = vmatprep.subr.mxu1 %v4331_v56 }
 0xc19   : > { %v1773_v28 = vpop.f32.mrf.mxu1 }
 0xc1a   : > { %2816 = vmatmul.mubr.f32.vlgmr.msra.gmra.mxu1 %v1773_v28 }
 0xc1b   : > { %v2782_v29 = vpop.f32.mrf.mxu1  ;;  %2854 = vmatpush3.msra.mxu1 %v4365_v30  ;;  %2885 = vmatprep.mubr.msk.f32.mxu1 %vm3016_vm0, %v4331_v56 }
 0xc1c   : > { %2855 = vmatprep.subr.mxu1 %v4331_v56 }
 0xc1d   : > { %2856 = vmatpush3.msra.mxu1 %v4366_v32 }
 0xc1e   : > { %2857 = vmatprep.subr.mxu1 %v4331_v56 }
 0xc1f   : > { %2858 = vmatpush3.msra.mxu1 %v4367_v34 }
 0xc20   : > { %2859 = vmatprep.subr.mxu1 %v4331_v56 }
 0xc21   : > { %2860 = vmatpush3.msra.mxu1 %v4368_v35 }
 0xc22   : > { %2861 = vmatprep.subr.mxu1 %v4331_v56 }
 0xc23   : > { %2862 = vmatpush3.msra.mxu1 %v4369_v36 }
 0xc24   : > { %2863 = vmatprep.subr.mxu1 %v4331_v56 }
 0xc25   : > { %2864 = vmatpush3.msra.mxu1 %v4370_v37 }
 0xc26   : > { %2865 = vmatprep.subr.mxu1 %v4331_v56 }
 0xc27   : > { %2866 = vmatpush3.msra.mxu1 %v4371_v38 }
 0xc28   : > { %2867 = vmatprep.subr.mxu1 %v4331_v56 }
 0xc29   : > { %2868 = vmatpush3.msra.mxu1 %v4372_v39 }
 0xc2a   : > { %2869 = vmatprep.subr.mxu1 %v4331_v56 }
 0xc2b   : > { %2870 = vmatpush3.msra.mxu1 %v4373_v40 }
 0xc2c   : > { %2871 = vmatprep.subr.mxu1 %v4331_v56 }
 0xc2d   : > { %2872 = vmatpush3.msra.mxu1 %v4374_v41 }
 0xc2e   : > { %2873 = vmatprep.subr.mxu1 %v4331_v56 }
 0xc2f   : > { %2874 = vmatpush3.msra.mxu1 %v4375_v42 }
 0xc30   : > { %2875 = vmatprep.subr.mxu1 %v4331_v56 }
 0xc31   : > { %2876 = vmatpush3.msra.mxu1 %v4376_v43 }
 0xc32   : > { %2877 = vmatprep.subr.mxu1 %v4331_v56 }
 0xc33   : > { %2878 = vmatpush3.msra.mxu1 %v4377_v44 }
 0xc34   : > { %2879 = vmatprep.subr.mxu1 %v4331_v56 }
 0xc35   : > { %2880 = vmatpush3.msra.mxu1 %v3919_v1 }
 0xc36   : > { %2881 = vmatprep.subr.mxu1 %v4331_v56 }
 0xc37   : > { %2882 = vmatpush3.msra.mxu1 %v3926_v2 }
 0xc38   : > { %2883 = vmatprep.subr.mxu1 %v4331_v56 }
 0xc39   : > { %2884 = vmatpush3.msra.mxu1 %v3933_v4 }
 0xcda   : > { %v1866_v45 = vpop.f32.mrf.mxu1 }
 0xcdb   : > { %v1867_v47 = vadd.f32 %v4378_v46, %v1866_v45 }
 0xcdc   : > { %v2817_v48 = vpop.f32.mrf.mxu1 }
 0xcdd   : > { %v1870_v49 = vadd.f32 %v1867_v47, %v3991_v31  ;;  %v2226_v31 = vld [vmem:[%s4207_s13 + $0x1] ss:$0 sm:$0xff] }
 0xcdf   : > { %1871 = vadd.xlane.f32.xlu0 %v1870_v49 }
 0xd68   : > { %v1872_v50 = vpop.xlane.xlu0 %1871 }
 0xd69   : > { %v1873_v59 = vmul.f32 0.03125, %v1872_v50 }
 0xd6b   : > { %v1874_v33 = vsub.f32 %v1870_v49, %v1873_v59 }
 0xd6d   : > { %v1875_v1 = vmul.f32 %v3663_v60, %v1874_v33  ;;  %v1895_v54 = vmul.f32 %v2226_v31, %v1874_v33 }
 0xd6f   : > { %v1876_v61 = vmul.f32 %v1875_v1, %v1875_v1 }
 0xd71   : > { %1877 = vadd.xlane.f32.xlu1 %v1876_v61 }
 0xdfa   : > { %v1878_v51 = vpop.xlane.xlu1 %1877 }
 0xdfb   : > { %v1879_v2 = vmul.f32 0.032258064, %v1878_v51 }
 0xdfd   : > { %2945 = vrsqrt.f32 %v1879_v2  ;;  %vm1882_vm7 = vcmp.eq.f32.partialorder %v1879_v2, inf  ;;  %v1885_v4 = vand.u32 2147483648, %v1879_v2  ;;  %vm1884_vm8 = vcmp.eq.f32.partialorder %v1879_v2, 0.0 }
 0xe0a   : > { %v2946_v56 = vpop.eup %2945 }
 0xe0b   : > { %v1881_v58 = vmul.f32 %v2946_v56, %v1879_v2 }
 0xe0d   : > { %v1883_v62 = vsel %vm1882_vm7, %v1879_v2, %v1881_v58 }
 0xe0e   : > { %v1886_v55 = vsel %vm1884_vm8, %v1885_v4, %v1883_v62 }
 0xe0f   : > { %v1887_v63 = vadd.f32 1e-06, %v1886_v55 }
 0xe11   : > { %2947 = vrcp.f32 %v1887_v63 }
 0xe1e   : > { %v2948_v57 = vpop.eup %2947 }
 0xe1f   : > { %v1896_v52 = vmul.f32 %v2948_v57, %v1895_v54 }
 0xe21   : > { %v1903_v8 = vadd.f32 %v2227_v53, %v1896_v52 }
 0xe23   : > { %2851 = vmatmul.mubr.f32.vlgmr.msra.gmra.mxu0 %v1903_v8 }
 0xee3   : > { %v1993_v10 = vpop.f32.mrf.mxu0 }
 0xee4   : > { %v1994_v12 = vadd.f32 %v3940_v6, %v1993_v10 }
 0xee5   : > { %v2852_v14 = vpop.f32.mrf.mxu0 }
 0xee6   : > { %v1997_v3 = vmax.f32 %v1994_v12, 0.0 }
 0xee8   : > { %2886 = vmatmul.mubr.f32.vlgmr.msra.gmra.mxu1 %v1997_v3 }
 0xfa8   : > { %v2087_v5 = vpop.f32.mrf.mxu1 }
 0xfa9   : > { %v2088_v7 = vadd.f32 %v3980_v0, %v2087_v5 }
 0xfaa   : > { %v2887_v9 = vpop.f32.mrf.mxu1 }
 0xfab   : > { %v2091_v11 = vadd.f32 %v2088_v7, %v1903_v8 }
 0xfad   : > { %2092 = vadd.xlane.f32.xlu0 %v2091_v11 }
0x1036   : > { %v2093_v13 = vpop.xlane.xlu0 %2092 }
0x1037   : > { %v2094_v15 = vmul.f32 0.03125, %v2093_v13 }
0x1039   : > { %v2095_v16 = vsub.f32 %v2091_v11, %v2094_v15 }
0x103b   : > { %v2096_v17 = vmul.f32 %v3663_v60, %v2095_v16  ;;  %v2230_v60 = vld [vmem:[%s4209_s15 + $0x1] ss:$0 sm:$0xff] }
0x103c   : > { %v2116_v25 = vmul.f32 %v2230_v60, %v2095_v16 }
0x103d   : > { %v2097_v18 = vmul.f32 %v2096_v17, %v2096_v17 }
0x103f   : > { %2098 = vadd.xlane.f32.xlu1 %v2097_v18 }
0x10c8   : > { %v2099_v19 = vpop.xlane.xlu1 %2098 }
0x10c9   : > { %v2100_v20 = vmul.f32 0.032258064, %v2099_v19 }
0x10cb   : > { %2949 = vrsqrt.f32 %v2100_v20  ;;  %vm2103_vm9 = vcmp.eq.f32.partialorder %v2100_v20, inf  ;;  %v2106_v22 = vand.u32 2147483648, %v2100_v20  ;;  %vm2105_vm10 = vcmp.eq.f32.partialorder %v2100_v20, 0.0 }
0x10d8   : > { %v2950_v6 = vpop.eup %2949 }
0x10d9   : > { %v2102_v21 = vmul.f32 %v2950_v6, %v2100_v20 }
0x10db   : > { %v2104_v0 = vsel %vm2103_vm9, %v2100_v20, %v2102_v21 }
0x10dc   : > { %v2107_v23 = vsel %vm2105_vm10, %v2106_v22, %v2104_v0 }
0x10dd   : > { %v2108_v24 = vadd.f32 1e-06, %v2107_v23 }
0x10df   : > { %2951 = vrcp.f32 %v2108_v24 }
0x10ec   : > { %v2952_v26 = vpop.eup %2951 }
0x10ed   : > { %v2117_v28 = vmul.f32 %v2952_v26, %v2116_v25 }
0x10ef   : > { %v2124_v29 = vadd.f32 %v2231_v27, %v2117_v28 }
0x10f1   : > { %2125 = vst [vmem:[%s539_s26] sm:$0xff] %v2124_v29 }
0x10f2   : > { %2966 = shalt.err (!%p2963_p3)
}
0x10f3   : > { %s2967_s19 = scalar_lea.hbm %s2138_s4, 128  ;;  %s2971_s29 = scalar_lea.hbm %s4211_s17, 256 }
0x10f4   : > { %p2968_p4 = scmp.ne.s32.totalorder %s2138_s4, %s2967_s19  ;;  %p2972_p9 = scmp.lt.s32.totalorder %s2138_s4, %s4211_s17 }
0x10f5   : > { %p2973_p10 = scmp.lt.s32.totalorder %s2971_s29, %s2967_s19 }
0x10f6   : > { %p2969_p7 = pnand %p2968_p4, %p3146_p5 }
0x10f7   : > { %p2974_p11 = por %p2973_p10, %p2972_p9 }
0x10f8   : > { %p2970_p8 = pneg %p2969_p7 }
0x10fa   : > { %p2975_p12 = pnand %p2974_p11, %p2970_p8 }
0x10fc   : > { %2978 = shalt.err (!%p2975_p12)
}
0x10fd   : > { %2888 = dma.vmem_to_hbm [thread:$0]  (%p3146_p5), %s2141_s0, 128, %s2138_s4, %s2127_s21  }
0x10fe PF: > { %p2894_p13 = scmp.ge.s32.totalorder %s3013_s27, 2  ;;  %s2152_s26 = sand.u32 1, %s3001_s24  }
0x10ff   : > { %s2153_s20 = scalar_lea.sflag [#allocation3], %s2152_s26 }
0x1100   : > { %p2891_p0 = pnand %p2894_p13, %p3150_p6 }
0x1102   : > { %p2892_p1 = pneg %p2891_p0 }
0x1104   : > { %2996 = dma.done.wait (%p2892_p1), %s2153_s20, 128  }
0x1105   : > { %2998 = vsyncadd (%p2892_p1), %s2153_s20, 4294967168  ;;  %s4380_s27 = sld [smem:[#allocation6_spill]]  ;;  %s4383_s24 = smov %s3005_s25 }
0x1106   : > { %s4381_s18 = sld [smem:[#allocation5_spill]] }
0x1107   : > { %s4382_s26 = sld [smem:[#allocation7_spill]] }
0x110b   : > { %p27_p2 = scmp.ge.s32.totalorder %s4380_s27, 4  }
0x110c   : > { %s4384_s25 = smov %s4381_s18 }
0x110d   :  { %29 = sbr.rel (!%p27_p2) target bundleno = 10 (0xa), region = 127 }
0x1112   :  { %2158 = vsyncpa [#allocation3], 1 }
0x1113   :  { %2160 = vsyncpa [#allocation3 + $0x1], 1 }

</bundles_post_ra>
